<compile_context>
chip_gen: v7x
topology: tpu7x:2x2x1
jax: 0.10.0
libtpu: 0.0.40
codegen_flags: <defaults>
</compile_context>

<pallas_src>
import numpy as np
import jax
import jax.numpy as jnp
from jax.experimental import pallas as pl
from jax.experimental.pallas import tpu as pltpu

LANE = 128                       # lane width / lane-dense output padding
MAX_TILE = 512                   # row-tile cap (re-derived for v7x 64 MiB VMEM)
LOG2 = 0.6931471805599453        # ShiftedSoftplus shift

_CPARAMS = pltpu.CompilerParams(
    dimension_semantics=("parallel",),          # shard rows across TCs (v7x)
    vmem_limit_bytes=32 * 1024 * 1024,          # explicit scoped-VMEM budget
)


# --------------------------------------------------------------------------
# small helpers
# --------------------------------------------------------------------------

def _round_up(n, m):
    return -(-n // m) * m


def _row_tile(n):
    """Row tile: >=2 grid steps when possible (v7x dual-TC), sublane multiple
    of 8, capped at MAX_TILE rows."""
    return min(MAX_TILE, max(8, _round_up(-(-n // 2), 8)))


def _pad_rows(x, tile):
    pad = (-x.shape[0]) % tile
    if pad:
        x = jnp.pad(x, ((0, pad),) + ((0, 0),) * (x.ndim - 1))
    return x


def _const_spec(shape):
    """BlockSpec for a weight that is fully resident every grid step."""
    return pl.BlockSpec(shape, lambda *_: (0,) * len(shape))


# --------------------------------------------------------------------------
# Pallas kernels
# --------------------------------------------------------------------------

def _linear_kernel(x_ref, w_ref, b_ref, o_ref):
    # y = x @ W + b   (bf16 MXU inputs, f32 accumulate, bf16 lane-dense store)
    x = x_ref[...].astype(jnp.bfloat16)
    y = jnp.dot(x, w_ref[...], preferred_element_type=jnp.float32) + b_ref[...]
    o_ref[...] = y.astype(o_ref.dtype)


def embed_pallas(x, wt, brow):
    """torch nn.Linear (node-indicator column baked into a padded zero weight
    column + 0/1 bias) -> lane-dense 128-wide bf16 output."""
    x = jnp.asarray(x, jnp.float32)
    n = x.shape[0]
    t = _row_tile(n)
    xp = _pad_rows(x, t)
    N, In = xp.shape
    Out = wt.shape[1]
    y = pl.pallas_call(
        _linear_kernel,
        out_shape=jax.ShapeDtypeStruct((N, Out), jnp.bfloat16),
        grid=(N // t,),
        in_specs=[pl.BlockSpec((t, In), lambda i: (i, 0)),
                  _const_spec(wt.shape),
                  _const_spec(brow.shape)],
        out_specs=pl.BlockSpec((t, Out), lambda i: (i, 0)),
        compiler_params=_CPARAMS,
    )(xp, wt, brow)
    return y[:n]


def _fusion_vinf_kernel(pos_ref, h_ref,
                        wpp_ref, bpp_ref, wpv_ref, bpv_ref, wpo_ref, bpo_ref,
                        whp_ref, bhp_ref, whv_ref, bhv_ref, who_ref, bho_ref,
                        w1_ref, b1_ref, w2_ref, b2_ref,
                        pos_o_ref, v_o_ref):
    """AttentionFusionModule + v_inference for one row tile.

    Global and local encoder outputs are identical (identity pass-through
    TODO), so each 2-token self-attention sees two identical tokens: every
    softmax row is exactly [1/2, 1/2] regardless of heads/scale, the per-token
    context reduces exactly to the value projection, and the mean over tokens
    is a no-op.  MultiheadAttention.out_proj followed by pos_mlp / h_mlp is
    affine∘affine and folded offline (exact).  Outputs are lane-padded to 128
    columns (zero weight/bias columns) so all stores are unmasked full-lane.
    """
    f32 = jnp.float32
    # ---- position path: raw coordinates kept in f32 end-to-end ----
    p = jnp.dot(pos_ref[...], wpp_ref[...], preferred_element_type=f32) + bpp_ref[...]
    pv = jnp.dot(p, wpv_ref[...], preferred_element_type=f32) + bpv_ref[...]
    pos_o_ref[...] = (jnp.dot(pv, wpo_ref[...], preferred_element_type=f32)
                      + bpo_ref[...])
    # ---- h path: bf16 activations on the MXU, f32 accumulate ----
    hp = jnp.dot(h_ref[...], whp_ref[...], preferred_element_type=f32) + bhp_ref[...]
    hv = jnp.dot(hp.astype(jnp.bfloat16), whv_ref[...],
                 preferred_element_type=f32) + bhv_ref[...]
    fh = jnp.dot(hv.astype(jnp.bfloat16), who_ref[...],
                 preferred_element_type=f32) + bho_ref[...]
    # ---- v_inference fused: Linear -> ShiftedSoftplus -> Linear ----
    z = jnp.dot(fh.astype(jnp.bfloat16), w1_ref[...],
                preferred_element_type=f32) + b1_ref[...]
    z = jax.nn.softplus(z) - LOG2
    v_o_ref[...] = (jnp.dot(z.astype(jnp.bfloat16), w2_ref[...],
                            preferred_element_type=f32) + b2_ref[...])


def fusion_vinf_pallas(fp, pos_all, h_all):
    """One pallas_call = AttentionFusionModule + v_inference over all rows.

    Returns padded, lane-padded outputs:
      pos_out: (Npad, 128) f32, real final_pos in columns [:3]
      v_out:   (Npad, 128) f32, real atom-type logits in columns [:K]
    """
    n = pos_all.shape[0]
    t = _row_tile(n)
    posp = _pad_rows(jnp.asarray(pos_all, jnp.float32), t)
    hp = _pad_rows(jnp.asarray(h_all, jnp.bfloat16), t)
    N = posp.shape[0]
    pdim, hdim = posp.shape[1], hp.shape[1]
    pos_w = fp["wpo"].shape[1]
    v_w = fp["w2"].shape[1]

    names = ("wpp", "bpp", "wpv", "bpv", "wpo", "bpo",
             "whp", "bhp", "whv", "bhv", "who", "bho",
             "w1", "b1", "w2", "b2")
    weights = [fp[k] for k in names]

    in_specs = [pl.BlockSpec((t, pdim), lambda i: (i, 0)),
                pl.BlockSpec((t, hdim), lambda i: (i, 0))]
    in_specs += [_const_spec(w.shape) for w in weights]

    pos_out, v_out = pl.pallas_call(
        _fusion_vinf_kernel,
        out_shape=(jax.ShapeDtypeStruct((N, pos_w), jnp.float32),
                   jax.ShapeDtypeStruct((N, v_w), jnp.float32)),
        grid=(N // t,),
        in_specs=in_specs,
        out_specs=(pl.BlockSpec((t, pos_w), lambda i: (i, 0)),
                   pl.BlockSpec((t, v_w), lambda i: (i, 0))),
        compiler_params=_CPARAMS,
    )(posp, hp, *weights)
    return pos_out, v_out


# --------------------------------------------------------------------------
# Diffusion schedule / helpers (plain JAX glue, all jit-able)
# --------------------------------------------------------------------------

def cosine_beta_schedule(timesteps, s=0.008):
    steps = timesteps + 1
    x = np.linspace(0, steps, steps)
    alphas_cumprod = np.cos(((x / steps) + s) / (1 + s) * np.pi * 0.5) ** 2
    alphas_cumprod = alphas_cumprod / alphas_cumprod[0]
    alphas = alphas_cumprod[1:] / alphas_cumprod[:-1]
    alphas = np.clip(alphas, a_min=0.001, a_max=1.0)
    return np.sqrt(alphas)


def log_1_min_a(a):
    return np.log(1.0 - np.exp(a) + 1e-40)


def build_schedules(num_timesteps, pos_beta_s, v_beta_s):
    alphas = cosine_beta_schedule(num_timesteps, pos_beta_s) ** 2
    betas = 1.0 - alphas
    alphas_cumprod = np.cumprod(alphas, axis=0)
    alphas_cumprod_prev = np.append(1.0, alphas_cumprod[:-1])
    posterior_variance = betas * (1.0 - alphas_cumprod_prev) / (1.0 - alphas_cumprod)

    alphas_v = cosine_beta_schedule(num_timesteps, v_beta_s)
    log_alphas_v = np.log(alphas_v)
    log_alphas_cumprod_v = np.cumsum(log_alphas_v)

    f = lambda a: jnp.asarray(a, jnp.float32)
    return dict(
        betas=f(betas),
        alphas_cumprod=f(alphas_cumprod),
        sqrt_recip_alphas_cumprod=f(np.sqrt(1.0 / alphas_cumprod)),
        sqrt_recipm1_alphas_cumprod=f(np.sqrt(1.0 / alphas_cumprod - 1)),
        posterior_mean_c0_coef=f(betas * np.sqrt(alphas_cumprod_prev) / (1.0 - alphas_cumprod)),
        posterior_mean_ct_coef=f((1.0 - alphas_cumprod_prev) * np.sqrt(alphas) / (1.0 - alphas_cumprod)),
        posterior_logvar=f(np.log(np.append(posterior_variance[1], posterior_variance[1:]))),
        log_alphas_v=f(log_alphas_v),
        log_one_minus_alphas_v=f(log_1_min_a(log_alphas_v)),
        log_alphas_cumprod_v=f(log_alphas_cumprod_v),
        log_one_minus_alphas_cumprod_v=f(log_1_min_a(log_alphas_cumprod_v)),
    )


def extract(coef, t, batch):
    return coef[t][batch][:, None]


def log_add_exp(a, b):
    m = jnp.maximum(a, b)
    return m + jnp.log(jnp.exp(a - m) + jnp.exp(b - m))


def index_to_log_onehot(v, K):
    onehot = jax.nn.one_hot(v, K, dtype=jnp.float32)
    return jnp.log(jnp.clip(onehot, 1e-30, 1.0))


def log_sample_categorical(key, logits):
    u = jax.random.uniform(key, logits.shape)
    gumbel = -jnp.log(-jnp.log(u + 1e-30) + 1e-30)
    return jnp.argmax(gumbel + logits, axis=-1)


def segment_mean(x, seg, num_segments):
    sums = jax.ops.segment_sum(x, seg, num_segments)
    counts = jax.ops.segment_sum(jnp.ones((x.shape[0],), x.dtype), seg, num_segments)
    if x.ndim > 1:
        counts = counts.reshape((num_segments,) + (1,) * (x.ndim - 1))
    return sums / counts


def q_v_pred(sched, log_v0, t, batch, K):
    log_c = extract(sched["log_alphas_cumprod_v"], t, batch)
    log_1mc = extract(sched["log_one_minus_alphas_cumprod_v"], t, batch)
    return log_add_exp(log_v0 + log_c, log_1mc - np.log(K))


def q_v_pred_one_timestep(sched, log_vt_1, t, batch, K):
    log_a = extract(sched["log_alphas_v"], t, batch)
    log_1ma = extract(sched["log_one_minus_alphas_v"], t, batch)
    return log_add_exp(log_vt_1 + log_a, log_1ma - np.log(K))


def q_v_posterior(sched, log_v0, log_vt, t, batch, K):
    tm1 = jnp.where(t - 1 < 0, jnp.zeros_like(t), t - 1)
    log_qvt1_v0 = q_v_pred(sched, log_v0, tm1, batch, K)
    unnormed = log_qvt1_v0 + q_v_pred_one_timestep(sched, log_vt, t, batch, K)
    return unnormed - jax.scipy.special.logsumexp(unnormed, axis=-1, keepdims=True)


def q_pos_posterior(sched, x0, xt, t, batch):
    return (extract(sched["posterior_mean_c0_coef"], t, batch) * x0
            + extract(sched["posterior_mean_ct_coef"], t, batch) * xt)


def compute_v_Lt(log_v_model_prob, log_v0, log_v_true_prob, t, batch, num_graphs):
    kl_v = jnp.sum(jnp.exp(log_v_true_prob) * (log_v_true_prob - log_v_model_prob), -1)
    decoder_nll_v = -jnp.sum(jnp.exp(log_v0) * log_v_model_prob, -1)
    mask = (t == 0).astype(jnp.float32)[batch]
    return segment_mean(mask * decoder_nll_v + (1.0 - mask) * kl_v, batch, num_graphs)


def compose_context(h_protein, h_ligand, pos_protein, pos_ligand,
                    batch_protein, batch_ligand):
    n_protein = batch_protein.shape[0]
    batch_ctx = jnp.concatenate([batch_protein, batch_ligand])
    is_ligand = jnp.concatenate([jnp.zeros_like(batch_protein),
                                 jnp.ones_like(batch_ligand)])
    sort_idx = jnp.argsort(batch_ctx * 2 + is_ligand, stable=True)
    h_all = jnp.concatenate([h_protein, h_ligand])[sort_idx]
    pos_all = jnp.concatenate([pos_protein, pos_ligand])[sort_idx]
    batch_all = batch_ctx[sort_idx]
    inv_idx = jnp.argsort(sort_idx)                 # original row -> composed position
    ligand_index = inv_idx[n_protein:]              # static-shape gather (jit-safe)
    return h_all, pos_all, batch_all, ligand_index


# --------------------------------------------------------------------------
# Parameters (torch-nn.Linear-style init, then kernel-ready preprocessing)
# --------------------------------------------------------------------------

def init_linear(key, out_dim, in_dim):
    k1, k2 = jax.random.split(key)
    bound = 1.0 / np.sqrt(in_dim)
    w = jax.random.uniform(k1, (out_dim, in_dim), jnp.float32, -bound, bound)
    b = jax.random.uniform(k2, (out_dim,), jnp.float32, -bound, bound)
    return w, b


def make_params(key, protein_dim, ligand_dim, hidden_dim, K):
    emb_dim = hidden_dim - 1                    # node_indicator=True
    pos_dim, h_dim = 3, hidden_dim
    new_pos_dim = pos_dim // 2 * 16             # 16
    new_h_dim = h_dim // 2 * 4                  # 256
    ks = jax.random.split(key, 12)
    return dict(
        protein_atom_emb=init_linear(ks[0], emb_dim, protein_dim),
        ligand_atom_emb=init_linear(ks[1], emb_dim, ligand_dim + 1),   # time_emb_mode='simple'
        v_inf1=init_linear(ks[2], hidden_dim, hidden_dim),
        v_inf2=init_linear(ks[3], K, hidden_dim),
        fusion=dict(
            pos_proj=init_linear(ks[4], new_pos_dim, pos_dim),
            h_proj=init_linear(ks[5], new_h_dim, h_dim),
            # MultiheadAttention: packed in_proj (3E, E) + out_proj (E, E)
            pos_attn=init_linear(ks[6], 3 * new_pos_dim, new_pos_dim)
                     + init_linear(ks[7], new_pos_dim, new_pos_dim),
            h_attn=init_linear(ks[8], 3 * new_h_dim, new_h_dim)
                   + init_linear(ks[9], new_h_dim, new_h_dim),
            pos_mlp=init_linear(ks[10], pos_dim, new_pos_dim),
            h_mlp=init_linear(ks[11], h_dim, new_h_dim),
        ),
    )


def prepare_params(raw):
    """Kernel-ready params: pre-transposed weights (bf16 for the h path, f32
    for the tiny pos path), (1, Out) f32 biases, exact out_proj∘mlp folds,
    value-projection slices of the packed MHA in_proj (q/k drop out exactly
    for identical attended tokens), node-indicator baked into the embedding
    weights, and all narrow outputs zero-padded to lane-dense 128 columns."""
    f32 = np.float32

    def _t(wb, dtype):
        w, b = np.asarray(wb[0], f32), np.asarray(wb[1], f32)
        return jnp.asarray(w.T, dtype), jnp.asarray(b.reshape(1, -1), jnp.float32)

    def _emb(wb, indicator):
        w, b = np.asarray(wb[0], f32), np.asarray(wb[1], f32)
        out, inp = w.shape
        wt = np.zeros((inp, out + 1), f32); wt[:, :out] = w.T
        bb = np.zeros((1, out + 1), f32); bb[0, :out] = b; bb[0, out] = indicator
        return jnp.asarray(wt, jnp.bfloat16), jnp.asarray(bb, jnp.float32)

    def _vslice(in_w, in_b, dtype):
        # value-projection slice of the packed in_proj (rows [2E:3E])
        E = np.asarray(in_w).shape[1]
        wv = np.asarray(in_w, f32)[2 * E:3 * E]
        bv = np.asarray(in_b, f32)[2 * E:3 * E]
        return jnp.asarray(wv.T, dtype), jnp.asarray(bv.reshape(1, -1), jnp.float32)

    def _fold(out_w, out_b, mlp_w, mlp_b, dtype):
        # exact affine fold: mlp(out_proj(x)); output zero-padded to >=128 cols
        wo_t = np.asarray(out_w, f32).T
        wm_t = np.asarray(mlp_w, f32).T
        wf = wo_t @ wm_t
        bf = np.asarray(out_b, f32)[None, :] @ wm_t + np.asarray(mlp_b, f32)[None, :]
        E, D = wf.shape
        Dp = max(LANE, _round_up(D, LANE))
        wpad = np.zeros((E, Dp), f32); wpad[:, :D] = wf
        bpad = np.zeros((1, Dp), f32); bpad[0, :D] = bf[0]
        return jnp.asarray(wpad, dtype), jnp.asarray(bpad, jnp.float32)

    def _pad_out(wb, dtype):
        # plain linear with output zero-padded to >=128 cols (lane-dense store)
        w, b = np.asarray(wb[0], f32), np.asarray(wb[1], f32)   # (Out, In)
        out, inp = w.shape
        Dp = max(LANE, _round_up(out, LANE))
        wt = np.zeros((inp, Dp), f32); wt[:, :out] = w.T
        bb = np.zeros((1, Dp), f32); bb[0, :out] = b
        return jnp.asarray(wt, dtype), jnp.asarray(bb, jnp.float32)

    fu = raw["fusion"]
    wpp, bpp = _t(fu["pos_proj"], jnp.float32)                       # pos path: f32
    whp, bhp = _t(fu["h_proj"], jnp.bfloat16)
    wpv, bpv = _vslice(fu["pos_attn"][0], fu["pos_attn"][1], jnp.float32)
    whv, bhv = _vslice(fu["h_attn"][0], fu["h_attn"][1], jnp.bfloat16)
    wpo, bpo = _fold(fu["pos_attn"][2], fu["pos_attn"][3], *fu["pos_mlp"],
                     dtype=jnp.float32)
    who, bho = _fold(fu["h_attn"][2], fu["h_attn"][3], *fu["h_mlp"],
                     dtype=jnp.bfloat16)
    w1, b1 = _t(raw["v_inf1"], jnp.bfloat16)
    w2, b2 = _pad_out(raw["v_inf2"], jnp.bfloat16)
    pe_w, pe_b = _emb(raw["protein_atom_emb"], 0.0)   # node_indicator column = 0
    le_w, le_b = _emb(raw["ligand_atom_emb"], 1.0)    # node_indicator column = 1
    return dict(
        p_emb_w=pe_w, p_emb_b=pe_b, l_emb_w=le_w, l_emb_b=le_b,
        fusion=dict(wpp=wpp, bpp=bpp, wpv=wpv, bpv=bpv, wpo=wpo, bpo=bpo,
                    whp=whp, bhp=bhp, whv=whv, bhv=bhv, who=who, bho=bho,
                    w1=w1, b1=b1, w2=w2, b2=b2),
    )


# --------------------------------------------------------------------------
# SurfDM forward (model_mean_type='C0', center_pos_mode='protein',
#                 time_emb_mode='simple', node_indicator=True) — jit-able
# --------------------------------------------------------------------------

def surfdm_forward(params, sched, protein_pos, protein_v, batch_protein,
                   ligand_pos, ligand_v, batch_ligand, time_step, rng, loss_v_weight,
                   *, num_graphs, num_classes, num_timesteps):
    K, T = num_classes, num_timesteps

    # center_pos (mode='protein')
    offset = segment_mean(protein_pos, batch_protein, num_graphs)
    protein_pos = protein_pos - offset[batch_protein]
    ligand_pos = ligand_pos - offset[batch_ligand]
    pt = jnp.ones_like(time_step, dtype=jnp.float32) / T

    # perturb positions
    a = sched["alphas_cumprod"][time_step]
    a_pos = a[batch_ligand][:, None]
    k_noise, k_cat = jax.random.split(rng)
    pos_noise = jax.random.normal(k_noise, ligand_pos.shape, jnp.float32)
    ligand_pos_perturbed = jnp.sqrt(a_pos) * ligand_pos + jnp.sqrt(1.0 - a_pos) * pos_noise

    # perturb types
    log_ligand_v0 = index_to_log_onehot(ligand_v, K)
    log_qvt_v0 = q_v_pred(sched, log_ligand_v0, time_step, batch_ligand, K)
    ligand_v_perturbed = log_sample_categorical(k_cat, log_qvt_v0)
    log_ligand_vt = index_to_log_onehot(ligand_v_perturbed, K)

    init_ligand_v = jax.nn.one_hot(ligand_v_perturbed, K, dtype=jnp.float32)
    time_feat = (time_step.astype(jnp.float32) / T)[batch_ligand][:, None]
    input_ligand_feat = jnp.concatenate([init_ligand_v, time_feat], -1)

    # atom embeddings: lane-dense 128-wide bf16 outputs; node-indicator column
    # baked into the padded weight (zero col) + bias (0 / 1) — no concat needed.
    h_protein = embed_pallas(protein_v, params["p_emb_w"], params["p_emb_b"])
    init_ligand_h = embed_pallas(input_ligand_feat, params["l_emb_w"], params["l_emb_b"])

    h_all, pos_all, batch_all, ligand_index = compose_context(
        h_protein, init_ligand_h, protein_pos, ligand_pos_perturbed,
        batch_protein, batch_ligand)

    # TODO(synk): encoder_gloab (UniTransformerO2TwoUpdateGeneral) and
    # encoder_local (EGNN) definitions were not provided; identity pass-through.
    # Global and local outputs are therefore identical -> each tensor is passed
    # ONCE to the fused kernel (single DMA stream per activation).
    final_pos_all, final_h_all = pos_all, h_all

    # One pallas_call = AttentionFusionModule + v_inference (lane-padded outs).
    pos_out_pad, v_out_pad = fusion_vinf_pallas(params["fusion"],
                                                final_pos_all, final_h_all)

    pred_ligand_pos = pos_out_pad[ligand_index][:, :3]
    pred_ligand_v = v_out_pad[ligand_index][:, :K]

    pred_pos_noise = pred_ligand_pos - ligand_pos_perturbed
    # model_mean_type == 'C0'
    pos_model_mean = q_pos_posterior(sched, pred_ligand_pos, ligand_pos_perturbed,
                                     time_step, batch_ligand)
    target, pred = ligand_pos, pred_ligand_pos
    loss_pos = jnp.mean(segment_mean(jnp.sum((pred - target) ** 2, -1),
                                     batch_ligand, num_graphs))

    log_ligand_v_recon = jax.nn.log_softmax(pred_ligand_v, axis=-1)
    log_v_model_prob = q_v_posterior(sched, log_ligand_v_recon, log_ligand_vt,
                                     time_step, batch_ligand, K)
    log_v_true_prob = q_v_posterior(sched, log_ligand_v0, log_ligand_vt,
                                    time_step, batch_ligand, K)
    kl_v = compute_v_Lt(log_v_model_prob, log_ligand_v0, log_v_true_prob,
                        time_step, batch_ligand, num_graphs)
    loss_v = jnp.mean(kl_v)
    loss = loss_pos + loss_v * loss_v_weight

    return {
        "loss_pos": loss_pos, "loss_v": loss_v, "loss": loss,
        "x0": ligand_pos,
        "pred_ligand_pos": pred_ligand_pos,
        "pred_ligand_v": pred_ligand_v,
        "pred_pos_noise": pred_pos_noise,
        "ligand_v_recon": jax.nn.softmax(pred_ligand_v, axis=-1),
        "pos_model_mean": pos_model_mean,
        "pt": pt,
    }


# --------------------------------------------------------------------------
# main
# --------------------------------------------------------------------------

if __name__ == "__main__":
    key = jax.random.PRNGKey(0)
    k_param, k_pp, k_pv, k_lp, k_lv, k_fwd = jax.random.split(key, 6)

    num_timesteps = 100
    num_classes = 8           # ligand_atom_feature_dim
    hidden_dim = 128
    loss_v_weight = 100.0
    protein_atom_feature_dim = 6
    ligand_atom_feature_dim = num_classes

    sched = build_schedules(num_timesteps, pos_beta_s=0.01, v_beta_s=0.01)
    raw_params = make_params(k_param, protein_atom_feature_dim,
                             ligand_atom_feature_dim, hidden_dim, num_classes)
    params = prepare_params(raw_params)

    # small synthetic batch: 2 graphs, 12 protein atoms + 4 ligand atoms each
    Np, Nl = 24, 8
    protein_pos = jax.random.normal(k_pp, (Np, 3), jnp.float32) * 3.0
    protein_v = jax.random.normal(k_pv, (Np, protein_atom_feature_dim), jnp.float32)
    batch_protein = jnp.repeat(jnp.arange(2, dtype=jnp.int32), Np // 2)
    ligand_pos = jax.random.normal(k_lp, (Nl, 3), jnp.float32)
    ligand_v = jax.random.randint(k_lv, (Nl,), 0, num_classes, jnp.int32)
    batch_ligand = jnp.repeat(jnp.arange(2, dtype=jnp.int32), Nl // 2)
    time_step = jnp.array([7, 91], dtype=jnp.int32)
    num_graphs = 2

    fwd = jax.jit(surfdm_forward,
                  static_argnames=("num_graphs", "num_classes", "num_timesteps"))
    out = fwd(params, sched, protein_pos, protein_v, batch_protein,
              ligand_pos, ligand_v, batch_ligand, time_step, k_fwd, loss_v_weight,
              num_graphs=num_graphs, num_classes=num_classes,
              num_timesteps=num_timesteps)
    jax.block_until_ready(out["loss"])
    assert out["pred_ligand_pos"].shape == (Nl, 3)
    assert out["pred_ligand_v"].shape == (Nl, num_classes)
    assert bool(jnp.isfinite(out["loss"]))
    print("KERNEL_OK")
</pallas_src>

<mosaic_0001>
module attributes {stable_mosaic.version = 11 : i64} {
  func.func @_linear_kernel(%arg0: i32, %arg1: memref<16x6xf32, #tpu.memory_space<vmem>>, %arg2: memref<6x128xbf16, #tpu.memory_space<vmem>>, %arg3: memref<1x128xf32, #tpu.memory_space<vmem>>, %arg4: memref<16x128xbf16, #tpu.memory_space<vmem>>) attributes {dimension_semantics = [#tpu.dimension_semantics<parallel>], iteration_bounds = array<i64: 2>, scalar_prefetch = 0 : i64, scratch_operands = 0 : i64, tpu.core_type = #tpu.core_type<tc>, window_params = [{transform_indices = @transform_0, window_bounds = array<i64: 16, 6>}, {pipeline_mode = #tpu.pipeline_mode<synchronous>, transform_indices = @transform_1, window_bounds = array<i64: 6, 128>}, {pipeline_mode = #tpu.pipeline_mode<synchronous>, transform_indices = @transform_2, window_bounds = array<i64: 1, 128>}, {transform_indices = @transform_3, window_bounds = array<i64: 16, 128>}]} {
    %c0 = arith.constant 0 : index
    %c0_0 = arith.constant 0 : index
    %0 = vector.load %arg1[%c0, %c0_0] : memref<16x6xf32, #tpu.memory_space<vmem>>, vector<16x6xf32>
    %1 = arith.truncf %0 : vector<16x6xf32> to vector<16x6xbf16>
    %c0_1 = arith.constant 0 : index
    %c0_2 = arith.constant 0 : index
    %2 = vector.load %arg2[%c0_1, %c0_2] : memref<6x128xbf16, #tpu.memory_space<vmem>>, vector<6x128xbf16>
    %cst = arith.constant dense<0.000000e+00> : vector<16x128xf32>
    %3 = tpu.matmul %1, %2, %cst {dimension_numbers = #tpu.dot_dimension_numbers<[1], [0], [0], [1], [0, 0, 1, 1], [], []>} : vector<16x6xbf16>, vector<6x128xbf16>, vector<16x128xf32> -> vector<16x128xf32>
    %c0_3 = arith.constant 0 : index
    %c0_4 = arith.constant 0 : index
    %4 = vector.load %arg3[%c0_3, %c0_4] : memref<1x128xf32, #tpu.memory_space<vmem>>, vector<1x128xf32>
    %5 = vector.broadcast %4 : vector<1x128xf32> to vector<16x128xf32>
    %6 = arith.addf %3, %5 : vector<16x128xf32>
    %7 = arith.truncf %6 : vector<16x128xf32> to vector<16x128xbf16>
    %c0_5 = arith.constant 0 : index
    %c0_6 = arith.constant 0 : index
    %8 = vector.load %arg4[%c0_5, %c0_6] : memref<16x128xbf16, #tpu.memory_space<vmem>>, vector<16x128xbf16>
    tpu.vector_store %arg4[%c0_5, %c0_6], %7 {strides = array<i32>} : memref<16x128xbf16, #tpu.memory_space<vmem>>, vector<16x128xbf16>,
    return
  }
  func.func @transform_0(%arg0: i32) -> (i32, i32) {
    %c0_i32 = arith.constant 0 : i32
    %c0_i32_0 = arith.constant 0 : i32
    return %arg0, %c0_i32 : i32, i32
  }
  func.func @transform_1(%arg0: i32) -> (i32, i32) {
    %c0_i32 = arith.constant 0 : i32
    %c0_i32_0 = arith.constant 0 : i32
    %c0_i32_1 = arith.constant 0 : i32
    return %c0_i32, %c0_i32_0 : i32, i32
  }
  func.func @transform_2(%arg0: i32) -> (i32, i32) {
    %c0_i32 = arith.constant 0 : i32
    %c0_i32_0 = arith.constant 0 : i32
    %c0_i32_1 = arith.constant 0 : i32
    return %c0_i32, %c0_i32_0 : i32, i32
  }
  func.func @transform_3(%arg0: i32) -> (i32, i32) {
    %c0_i32 = arith.constant 0 : i32
    %c0_i32_0 = arith.constant 0 : i32
    return %arg0, %c0_i32 : i32, i32
  }
}

module attributes {stable_mosaic.version = 11 : i64} {
  func.func @_linear_kernel(%arg0: i32, %arg1: memref<8x9xf32, #tpu.memory_space<vmem>>, %arg2: memref<9x128xbf16, #tpu.memory_space<vmem>>, %arg3: memref<1x128xf32, #tpu.memory_space<vmem>>, %arg4: memref<8x128xbf16, #tpu.memory_space<vmem>>) attributes {dimension_semantics = [#tpu.dimension_semantics<parallel>], iteration_bounds = array<i64: 1>, scalar_prefetch = 0 : i64, scratch_operands = 0 : i64, tpu.core_type = #tpu.core_type<tc>, window_params = [{transform_indices = @transform_0, window_bounds = array<i64: 8, 9>}, {pipeline_mode = #tpu.pipeline_mode<synchronous>, transform_indices = @transform_1, window_bounds = array<i64: 9, 128>}, {pipeline_mode = #tpu.pipeline_mode<synchronous>, transform_indices = @transform_2, window_bounds = array<i64: 1, 128>}, {transform_indices = @transform_3, window_bounds = array<i64: 8, 128>}]} {
    %c0 = arith.constant 0 : index
    %c0_0 = arith.constant 0 : index
    %0 = vector.load %arg1[%c0, %c0_0] : memref<8x9xf32, #tpu.memory_space<vmem>>, vector<8x9xf32>
    %1 = arith.truncf %0 : vector<8x9xf32> to vector<8x9xbf16>
    %c0_1 = arith.constant 0 : index
    %c0_2 = arith.constant 0 : index
    %2 = vector.load %arg2[%c0_1, %c0_2] : memref<9x128xbf16, #tpu.memory_space<vmem>>, vector<9x128xbf16>
    %cst = arith.constant dense<0.000000e+00> : vector<8x128xf32>
    %3 = tpu.matmul %1, %2, %cst {dimension_numbers = #tpu.dot_dimension_numbers<[1], [0], [0], [1], [0, 0, 1, 1], [], []>} : vector<8x9xbf16>, vector<9x128xbf16>, vector<8x128xf32> -> vector<8x128xf32>
    %c0_3 = arith.constant 0 : index
    %c0_4 = arith.constant 0 : index
    %4 = vector.load %arg3[%c0_3, %c0_4] : memref<1x128xf32, #tpu.memory_space<vmem>>, vector<1x128xf32>
    %5 = vector.broadcast %4 : vector<1x128xf32> to vector<8x128xf32>
    %6 = arith.addf %3, %5 : vector<8x128xf32>
    %7 = arith.truncf %6 : vector<8x128xf32> to vector<8x128xbf16>
    %c0_5 = arith.constant 0 : index
    %c0_6 = arith.constant 0 : index
    %8 = vector.load %arg4[%c0_5, %c0_6] : memref<8x128xbf16, #tpu.memory_space<vmem>>, vector<8x128xbf16>
    tpu.vector_store %arg4[%c0_5, %c0_6], %7 {strides = array<i32>} : memref<8x128xbf16, #tpu.memory_space<vmem>>, vector<8x128xbf16>,
    return
  }
  func.func @transform_0(%arg0: i32) -> (i32, i32) {
    %c0_i32 = arith.constant 0 : i32
    %c0_i32_0 = arith.constant 0 : i32
    return %arg0, %c0_i32 : i32, i32
  }
  func.func @transform_1(%arg0: i32) -> (i32, i32) {
    %c0_i32 = arith.constant 0 : i32
    %c0_i32_0 = arith.constant 0 : i32
    %c0_i32_1 = arith.constant 0 : i32
    return %c0_i32, %c0_i32_0 : i32, i32
  }
  func.func @transform_2(%arg0: i32) -> (i32, i32) {
    %c0_i32 = arith.constant 0 : i32
    %c0_i32_0 = arith.constant 0 : i32
    %c0_i32_1 = arith.constant 0 : i32
    return %c0_i32, %c0_i32_0 : i32, i32
  }
  func.func @transform_3(%arg0: i32) -> (i32, i32) {
    %c0_i32 = arith.constant 0 : i32
    %c0_i32_0 = arith.constant 0 : i32
    return %arg0, %c0_i32 : i32, i32
  }
}

module attributes {stable_mosaic.version = 11 : i64} {
  func.func @_fusion_vinf_kernel(%arg0: i32, %arg1: memref<16x3xf32, #tpu.memory_space<vmem>>, %arg2: memref<16x128xbf16, #tpu.memory_space<vmem>>, %arg3: memref<3x16xf32, #tpu.memory_space<vmem>>, %arg4: memref<1x16xf32, #tpu.memory_space<vmem>>, %arg5: memref<16x16xf32, #tpu.memory_space<vmem>>, %arg6: memref<1x16xf32, #tpu.memory_space<vmem>>, %arg7: memref<16x128xf32, #tpu.memory_space<vmem>>, %arg8: memref<1x128xf32, #tpu.memory_space<vmem>>, %arg9: memref<128x256xbf16, #tpu.memory_space<vmem>>, %arg10: memref<1x256xf32, #tpu.memory_space<vmem>>, %arg11: memref<256x256xbf16, #tpu.memory_space<vmem>>, %arg12: memref<1x256xf32, #tpu.memory_space<vmem>>, %arg13: memref<256x128xbf16, #tpu.memory_space<vmem>>, %arg14: memref<1x128xf32, #tpu.memory_space<vmem>>, %arg15: memref<128x128xbf16, #tpu.memory_space<vmem>>, %arg16: memref<1x128xf32, #tpu.memory_space<vmem>>, %arg17: memref<128x128xbf16, #tpu.memory_space<vmem>>, %arg18: memref<1x128xf32, #tpu.memory_space<vmem>>, %arg19: memref<16x128xf32, #tpu.memory_space<vmem>>, %arg20: memref<16x128xf32, #tpu.memory_space<vmem>>) attributes {dimension_semantics = [#tpu.dimension_semantics<parallel>], iteration_bounds = array<i64: 2>, scalar_prefetch = 0 : i64, scratch_operands = 0 : i64, tpu.core_type = #tpu.core_type<tc>, window_params = [{transform_indices = @transform_0, window_bounds = array<i64: 16, 3>}, {transform_indices = @transform_1, window_bounds = array<i64: 16, 128>}, {pipeline_mode = #tpu.pipeline_mode<synchronous>, transform_indices = @transform_2, window_bounds = array<i64: 3, 16>}, {pipeline_mode = #tpu.pipeline_mode<synchronous>, transform_indices = @transform_3, window_bounds = array<i64: 1, 16>}, {pipeline_mode = #tpu.pipeline_mode<synchronous>, transform_indices = @transform_4, window_bounds = array<i64: 16, 16>}, {pipeline_mode = #tpu.pipeline_mode<synchronous>, transform_indices = @transform_5, window_bounds = array<i64: 1, 16>}, {pipeline_mode = #tpu.pipeline_mode<synchronous>, transform_indices = @transform_6, window_bounds = array<i64: 16, 128>}, {pipeline_mode = #tpu.pipeline_mode<synchronous>, transform_indices = @transform_7, window_bounds = array<i64: 1, 128>}, {pipeline_mode = #tpu.pipeline_mode<synchronous>, transform_indices = @transform_8, window_bounds = array<i64: 128, 256>}, {pipeline_mode = #tpu.pipeline_mode<synchronous>, transform_indices = @transform_9, window_bounds = array<i64: 1, 256>}, {pipeline_mode = #tpu.pipeline_mode<synchronous>, transform_indices = @transform_10, window_bounds = array<i64: 256, 256>}, {pipeline_mode = #tpu.pipeline_mode<synchronous>, transform_indices = @transform_11, window_bounds = array<i64: 1, 256>}, {pipeline_mode = #tpu.pipeline_mode<synchronous>, transform_indices = @transform_12, window_bounds = array<i64: 256, 128>}, {pipeline_mode = #tpu.pipeline_mode<synchronous>, transform_indices = @transform_13, window_bounds = array<i64: 1, 128>}, {pipeline_mode = #tpu.pipeline_mode<synchronous>, transform_indices = @transform_14, window_bounds = array<i64: 128, 128>}, {pipeline_mode = #tpu.pipeline_mode<synchronous>, transform_indices = @transform_15, window_bounds = array<i64: 1, 128>}, {pipeline_mode = #tpu.pipeline_mode<synchronous>, transform_indices = @transform_16, window_bounds = array<i64: 128, 128>}, {pipeline_mode = #tpu.pipeline_mode<synchronous>, transform_indices = @transform_17, window_bounds = array<i64: 1, 128>}, {transform_indices = @transform_18, window_bounds = array<i64: 16, 128>}, {transform_indices = @transform_19, window_bounds = array<i64: 16, 128>}]} {
    %c0 = arith.constant 0 : index
    %c0_0 = arith.constant 0 : index
    %0 = vector.load %arg1[%c0, %c0_0] : memref<16x3xf32, #tpu.memory_space<vmem>>, vector<16x3xf32>
    %c0_1 = arith.constant 0 : index
    %c0_2 = arith.constant 0 : index
    %1 = vector.load %arg3[%c0_1, %c0_2] : memref<3x16xf32, #tpu.memory_space<vmem>>, vector<3x16xf32>
    %cst = arith.constant dense<0.000000e+00> : vector<16x16xf32>
    %2 = tpu.matmul %0, %1, %cst {dimension_numbers = #tpu.dot_dimension_numbers<[1], [0], [0], [1], [0, 0, 1, 1], [], []>} : vector<16x3xf32>, vector<3x16xf32>, vector<16x16xf32> -> vector<16x16xf32>
    %c0_3 = arith.constant 0 : index
    %c0_4 = arith.constant 0 : index
    %3 = vector.load %arg4[%c0_3, %c0_4] : memref<1x16xf32, #tpu.memory_space<vmem>>, vector<1x16xf32>
    %4 = vector.broadcast %3 : vector<1x16xf32> to vector<16x16xf32>
    %5 = arith.addf %2, %4 : vector<16x16xf32>
    %c0_5 = arith.constant 0 : index
    %c0_6 = arith.constant 0 : index
    %6 = vector.load %arg5[%c0_5, %c0_6] : memref<16x16xf32, #tpu.memory_space<vmem>>, vector<16x16xf32>
    %cst_7 = arith.constant dense<0.000000e+00> : vector<16x16xf32>
    %7 = tpu.matmul %5, %6, %cst_7 {dimension_numbers = #tpu.dot_dimension_numbers<[1], [0], [0], [1], [0, 0, 1, 1], [], []>} : vector<16x16xf32>, vector<16x16xf32>, vector<16x16xf32> -> vector<16x16xf32>
    %c0_8 = arith.constant 0 : index
    %c0_9 = arith.constant 0 : index
    %8 = vector.load %arg6[%c0_8, %c0_9] : memref<1x16xf32, #tpu.memory_space<vmem>>, vector<1x16xf32>
    %9 = vector.broadcast %8 : vector<1x16xf32> to vector<16x16xf32>
    %10 = arith.addf %7, %9 : vector<16x16xf32>
    %c0_10 = arith.constant 0 : index
    %c0_11 = arith.constant 0 : index
    %11 = vector.load %arg7[%c0_10, %c0_11] : memref<16x128xf32, #tpu.memory_space<vmem>>, vector<16x128xf32>
    %cst_12 = arith.constant dense<0.000000e+00> : vector<16x128xf32>
    %12 = tpu.matmul %10, %11, %cst_12 {dimension_numbers = #tpu.dot_dimension_numbers<[1], [0], [0], [1], [0, 0, 1, 1], [], []>} : vector<16x16xf32>, vector<16x128xf32>, vector<16x128xf32> -> vector<16x128xf32>
    %c0_13 = arith.constant 0 : index
    %c0_14 = arith.constant 0 : index
    %13 = vector.load %arg8[%c0_13, %c0_14] : memref<1x128xf32, #tpu.memory_space<vmem>>, vector<1x128xf32>
    %14 = vector.broadcast %13 : vector<1x128xf32> to vector<16x128xf32>
    %15 = arith.addf %12, %14 : vector<16x128xf32>
    %c0_15 = arith.constant 0 : index
    %c0_16 = arith.constant 0 : index
    %16 = vector.load %arg19[%c0_15, %c0_16] : memref<16x128xf32, #tpu.memory_space<vmem>>, vector<16x128xf32>
    tpu.vector_store %arg19[%c0_15, %c0_16], %15 {strides = array<i32>} : memref<16x128xf32, #tpu.memory_space<vmem>>, vector<16x128xf32>,
    %c0_17 = arith.constant 0 : index
    %c0_18 = arith.constant 0 : index
    %17 = vector.load %arg2[%c0_17, %c0_18] : memref<16x128xbf16, #tpu.memory_space<vmem>>, vector<16x128xbf16>
    %c0_19 = arith.constant 0 : index
    %c0_20 = arith.constant 0 : index
    %18 = vector.load %arg9[%c0_19, %c0_20] : memref<128x256xbf16, #tpu.memory_space<vmem>>, vector<128x256xbf16>
    %cst_21 = arith.constant dense<0.000000e+00> : vector<16x256xf32>
    %19 = tpu.matmul %17, %18, %cst_21 {dimension_numbers = #tpu.dot_dimension_numbers<[1], [0], [0], [1], [0, 0, 1, 1], [], []>} : vector<16x128xbf16>, vector<128x256xbf16>, vector<16x256xf32> -> vector<16x256xf32>
    %c0_22 = arith.constant 0 : index
    %c0_23 = arith.constant 0 : index
    %20 = vector.load %arg10[%c0_22, %c0_23] : memref<1x256xf32, #tpu.memory_space<vmem>>, vector<1x256xf32>
    %21 = vector.broadcast %20 : vector<1x256xf32> to vector<16x256xf32>
    %22 = arith.addf %19, %21 : vector<16x256xf32>
    %23 = arith.truncf %22 : vector<16x256xf32> to vector<16x256xbf16>
    %c0_24 = arith.constant 0 : index
    %c0_25 = arith.constant 0 : index
    %24 = vector.load %arg11[%c0_24, %c0_25] : memref<256x256xbf16, #tpu.memory_space<vmem>>, vector<256x256xbf16>
    %cst_26 = arith.constant dense<0.000000e+00> : vector<16x256xf32>
    %25 = tpu.matmul %23, %24, %cst_26 {dimension_numbers = #tpu.dot_dimension_numbers<[1], [0], [0], [1], [0, 0, 1, 1], [], []>} : vector<16x256xbf16>, vector<256x256xbf16>, vector<16x256xf32> -> vector<16x256xf32>
    %c0_27 = arith.constant 0 : index
    %c0_28 = arith.constant 0 : index
    %26 = vector.load %arg12[%c0_27, %c0_28] : memref<1x256xf32, #tpu.memory_space<vmem>>, vector<1x256xf32>
    %27 = vector.broadcast %26 : vector<1x256xf32> to vector<16x256xf32>
    %28 = arith.addf %25, %27 : vector<16x256xf32>
    %29 = arith.truncf %28 : vector<16x256xf32> to vector<16x256xbf16>
    %c0_29 = arith.constant 0 : index
    %c0_30 = arith.constant 0 : index
    %30 = vector.load %arg13[%c0_29, %c0_30] : memref<256x128xbf16, #tpu.memory_space<vmem>>, vector<256x128xbf16>
    %cst_31 = arith.constant dense<0.000000e+00> : vector<16x128xf32>
    %31 = tpu.matmul %29, %30, %cst_31 {dimension_numbers = #tpu.dot_dimension_numbers<[1], [0], [0], [1], [0, 0, 1, 1], [], []>} : vector<16x256xbf16>, vector<256x128xbf16>, vector<16x128xf32> -> vector<16x128xf32>
    %c0_32 = arith.constant 0 : index
    %c0_33 = arith.constant 0 : index
    %32 = vector.load %arg14[%c0_32, %c0_33] : memref<1x128xf32, #tpu.memory_space<vmem>>, vector<1x128xf32>
    %33 = vector.broadcast %32 : vector<1x128xf32> to vector<16x128xf32>
    %34 = arith.addf %31, %33 : vector<16x128xf32>
    %35 = arith.truncf %34 : vector<16x128xf32> to vector<16x128xbf16>
    %c0_34 = arith.constant 0 : index
    %c0_35 = arith.constant 0 : index
    %36 = vector.load %arg15[%c0_34, %c0_35] : memref<128x128xbf16, #tpu.memory_space<vmem>>, vector<128x128xbf16>
    %cst_36 = arith.constant dense<0.000000e+00> : vector<16x128xf32>
    %37 = tpu.matmul %35, %36, %cst_36 {dimension_numbers = #tpu.dot_dimension_numbers<[1], [0], [0], [1], [0, 0, 1, 1], [], []>} : vector<16x128xbf16>, vector<128x128xbf16>, vector<16x128xf32> -> vector<16x128xf32>
    %c0_37 = arith.constant 0 : index
    %c0_38 = arith.constant 0 : index
    %38 = vector.load %arg16[%c0_37, %c0_38] : memref<1x128xf32, #tpu.memory_space<vmem>>, vector<1x128xf32>
    %39 = vector.broadcast %38 : vector<1x128xf32> to vector<16x128xf32>
    %40 = arith.addf %37, %39 : vector<16x128xf32>
    %cst_39 = arith.constant 0.000000e+00 : f32
    %41 = vector.broadcast %cst_39 : f32 to vector<16x128xf32>
    %42 = arith.maximumf %40, %41 : vector<16x128xf32>
    %43 = vector.broadcast %cst_39 : f32 to vector<16x128xf32>
    %44 = arith.subf %40, %43 : vector<16x128xf32>
    %45 = arith.cmpf one, %44, %44 : vector<16x128xf32>
    %46 = vector.broadcast %cst_39 : f32 to vector<16x128xf32>
    %47 = arith.addf %40, %46 : vector<16x128xf32>
    %48 = math.absf %44 : vector<16x128xf32>
    %cst_40 = arith.constant 0.000000e+00 : f32
    %49 = vector.broadcast %cst_40 : f32 to vector<16x128xf32>
    %50 = arith.subf %49, %48 : vector<16x128xf32>
    %51 = math.exp %50 : vector<16x128xf32>
    %52 = math.log1p %51 : vector<16x128xf32>
    %53 = arith.addf %42, %52 : vector<16x128xf32>
    %54 = arith.select %45, %47, %53 : vector<16x128xi1>, vector<16x128xf32>
    %cst_41 = arith.constant 0.693147182 : f32
    %55 = vector.broadcast %cst_41 : f32 to vector<16x128xf32>
    %56 = arith.subf %54, %55 : vector<16x128xf32>
    %57 = arith.truncf %56 : vector<16x128xf32> to vector<16x128xbf16>
    %c0_42 = arith.constant 0 : index
    %c0_43 = arith.constant 0 : index
    %58 = vector.load %arg17[%c0_42, %c0_43] : memref<128x128xbf16, #tpu.memory_space<vmem>>, vector<128x128xbf16>
    %cst_44 = arith.constant dense<0.000000e+00> : vector<16x128xf32>
    %59 = tpu.matmul %57, %58, %cst_44 {dimension_numbers = #tpu.dot_dimension_numbers<[1], [0], [0], [1], [0, 0, 1, 1], [], []>} : vector<16x128xbf16>, vector<128x128xbf16>, vector<16x128xf32> -> vector<16x128xf32>
    %c0_45 = arith.constant 0 : index
    %c0_46 = arith.constant 0 : index
    %60 = vector.load %arg18[%c0_45, %c0_46] : memref<1x128xf32, #tpu.memory_space<vmem>>, vector<1x128xf32>
    %61 = vector.broadcast %60 : vector<1x128xf32> to vector<16x128xf32>
    %62 = arith.addf %59, %61 : vector<16x128xf32>
    %c0_47 = arith.constant 0 : index
    %c0_48 = arith.constant 0 : index
    %63 = vector.load %arg20[%c0_47, %c0_48] : memref<16x128xf32, #tpu.memory_space<vmem>>, vector<16x128xf32>
    tpu.vector_store %arg20[%c0_47, %c0_48], %62 {strides = array<i32>} : memref<16x128xf32, #tpu.memory_space<vmem>>, vector<16x128xf32>,
    return
  }
  func.func @transform_0(%arg0: i32) -> (i32, i32) {
    %c0_i32 = arith.constant 0 : i32
    %c0_i32_0 = arith.constant 0 : i32
    return %arg0, %c0_i32 : i32, i32
  }
  func.func @transform_1(%arg0: i32) -> (i32, i32) {
    %c0_i32 = arith.constant 0 : i32
    %c0_i32_0 = arith.constant 0 : i32
    return %arg0, %c0_i32 : i32, i32
  }
  func.func @transform_2(%arg0: i32) -> (i32, i32) {
    %c0_i32 = arith.constant 0 : i32
    %c0_i32_0 = arith.constant 0 : i32
    %c0_i32_1 = arith.constant 0 : i32
    return %c0_i32, %c0_i32_0 : i32, i32
  }
  func.func @transform_3(%arg0: i32) -> (i32, i32) {
    %c0_i32 = arith.constant 0 : i32
    %c0_i32_0 = arith.constant 0 : i32
    %c0_i32_1 = arith.constant 0 : i32
    return %c0_i32, %c0_i32_0 : i32, i32
  }
  func.func @transform_4(%arg0: i32) -> (i32, i32) {
    %c0_i32 = arith.constant 0 : i32
    %c0_i32_0 = arith.constant 0 : i32
    %c0_i32_1 = arith.constant 0 : i32
    return %c0_i32, %c0_i32_0 : i32, i32
  }
  func.func @transform_5(%arg0: i32) -> (i32, i32) {
    %c0_i32 = arith.constant 0 : i32
    %c0_i32_0 = arith.constant 0 : i32
    %c0_i32_1 = arith.constant 0 : i32
    return %c0_i32, %c0_i32_0 : i32, i32
  }
  func.func @transform_6(%arg0: i32) -> (i32, i32) {
    %c0_i32 = arith.constant 0 : i32
    %c0_i32_0 = arith.constant 0 : i32
    %c0_i32_1 = arith.constant 0 : i32
    return %c0_i32, %c0_i32_0 : i32, i32
  }
  func.func @transform_7(%arg0: i32) -> (i32, i32) {
    %c0_i32 = arith.constant 0 : i32
    %c0_i32_0 = arith.constant 0 : i32
    %c0_i32_1 = arith.constant 0 : i32
    return %c0_i32, %c0_i32_0 : i32, i32
  }
  func.func @transform_8(%arg0: i32) -> (i32, i32) {
    %c0_i32 = arith.constant 0 : i32
    %c0_i32_0 = arith.constant 0 : i32
    %c0_i32_1 = arith.constant 0 : i32
    return %c0_i32, %c0_i32_0 : i32, i32
  }
  func.func @transform_9(%arg0: i32) -> (i32, i32) {
    %c0_i32 = arith.constant 0 : i32
    %c0_i32_0 = arith.constant 0 : i32
    %c0_i32_1 = arith.constant 0 : i32
    return %c0_i32, %c0_i32_0 : i32, i32
  }
  func.func @transform_10(%arg0: i32) -> (i32, i32) {
    %c0_i32 = arith.constant 0 : i32
    %c0_i32_0 = arith.constant 0 : i32
    %c0_i32_1 = arith.constant 0 : i32
    return %c0_i32, %c0_i32_0 : i32, i32
  }
  func.func @transform_11(%arg0: i32) -> (i32, i32) {
    %c0_i32 = arith.constant 0 : i32
    %c0_i32_0 = arith.constant 0 : i32
    %c0_i32_1 = arith.constant 0 : i32
    return %c0_i32, %c0_i32_0 : i32, i32
  }
  func.func @transform_12(%arg0: i32) -> (i32, i32) {
    %c0_i32 = arith.constant 0 : i32
    %c0_i32_0 = arith.constant 0 : i32
    %c0_i32_1 = arith.constant 0 : i32
    return %c0_i32, %c0_i32_0 : i32, i32
  }
  func.func @transform_13(%arg0: i32) -> (i32, i32) {
    %c0_i32 = arith.constant 0 : i32
    %c0_i32_0 = arith.constant 0 : i32
    %c0_i32_1 = arith.constant 0 : i32
    return %c0_i32, %c0_i32_0 : i32, i32
  }
  func.func @transform_14(%arg0: i32) -> (i32, i32) {
    %c0_i32 = arith.constant 0 : i32
    %c0_i32_0 = arith.constant 0 : i32
    %c0_i32_1 = arith.constant 0 : i32
    return %c0_i32, %c0_i32_0 : i32, i32
  }
  func.func @transform_15(%arg0: i32) -> (i32, i32) {
    %c0_i32 = arith.constant 0 : i32
    %c0_i32_0 = arith.constant 0 : i32
    %c0_i32_1 = arith.constant 0 : i32
    return %c0_i32, %c0_i32_0 : i32, i32
  }
  func.func @transform_16(%arg0: i32) -> (i32, i32) {
    %c0_i32 = arith.constant 0 : i32
    %c0_i32_0 = arith.constant 0 : i32
    %c0_i32_1 = arith.constant 0 : i32
    return %c0_i32, %c0_i32_0 : i32, i32
  }
  func.func @transform_17(%arg0: i32) -> (i32, i32) {
    %c0_i32 = arith.constant 0 : i32
    %c0_i32_0 = arith.constant 0 : i32
    %c0_i32_1 = arith.constant 0 : i32
    return %c0_i32, %c0_i32_0 : i32, i32
  }
  func.func @transform_18(%arg0: i32) -> (i32, i32) {
    %c0_i32 = arith.constant 0 : i32
    %c0_i32_0 = arith.constant 0 : i32
    return %arg0, %c0_i32 : i32, i32
  }
  func.func @transform_19(%arg0: i32) -> (i32, i32) {
    %c0_i32 = arith.constant 0 : i32
    %c0_i32_0 = arith.constant 0 : i32
    return %arg0, %c0_i32 : i32, i32
  }
}

</mosaic_0001>

<bundles_post_ra>
// kernel: sub.87
= control target key start
LH: loop header
LB: loop body
LE: loop exit
PB: predicated region body
PF: predicated region fallthrough
CT: control target
= control target key end

     0   :  { %s78_s0 = inlined_call_operand.vmem [shape: f32[24,3], index: 0, kind: input, shape index: {}]   ;;  %s79_s1 = inlined_call_operand.vmem [shape: f32[24,3], index: 1, kind: input, shape index: {}]   ;;  %s80_s2 = inlined_call_operand.vmem [shape: f32[24,3], index: 2, kind: output, shape index: {}]  }
   0x1   :  { %v3_v0 = vld [vmem:[%s78_s0] sm:$0xff]  ;;  %v30_v2 = vld [vmem:[%s78_s0 + $0x8] sm:$0xff]  ;;  %v33_v5 = vld [vmem:[%s78_s0 + $0x10] sm:$0xff] }
   0x2   :  { %v4_v1 = vld [vmem:[%s79_s1] sm:$0xff]  ;;  %v31_v4 = vld [vmem:[%s79_s1 + $0x8] sm:$0xff]  ;;  %v34_v6 = vld [vmem:[%s79_s1 + $0x10] sm:$0xff] }
   0x3   :  { %v7_v3 = vsub.f32 %v3_v0, %v4_v1  ;;  %v16_v7 = vsub.f32 %v30_v2, %v31_v4  ;;  %v26_v8 = vsub.f32 %v33_v5, %v34_v6 }
   0x5   :  { %9 = vst [vmem:[%s80_s2] sm:$0xff] %v7_v3  ;;  %32 = vst [vmem:[%s80_s2 + $0x8] sm:$0xff] %v16_v7 }
   0x6   :  { %35 = vst [vmem:[%s80_s2 + $0x10] sm:$0xff] %v26_v8 }

// kernel: surfdm_forward.3
= control target key start
LH: loop header
LB: loop body
LE: loop exit
PB: predicated region body
PF: predicated region fallthrough
CT: control target
= control target key end

     0   :  { %s371_s12 = smov 0   ;;  %s394_s0 = inlined_call_operand.vmem [shape: f32[32,6], index: 0, kind: input, shape index: {}]   ;;  %s395_s1 = inlined_call_operand.vmem [shape: bf16[6,128], index: 1, kind: input, shape index: {}]   ;;  %s396_s2 = inlined_call_operand.vmem [shape: f32[1,128], index: 2, kind: input, shape index: {}]   ;;  %s397_s3 = inlined_call_operand.vmem [shape: bf16[32,128], index: 3, kind: output, shape index: {}]  }
   0x1 LB: > { %s301_s13 = sadd.s32 4294967295, %s347_s12   ;;  %p305_p0 = scmp.ge.s32.totalorder %s347_s12, 1  ;;  %s347_s12 = sphi %s371_s12, %s13_s12  }
   0x2   : > { %p138_p1 = scmp.lt.s32.totalorder %s347_s12, 3 }
   0x4   : > { %p139_p2 = pnand %p305_p0, %p138_p1 }
   0x5   : > { %v178_v0 = vld [vmem:[%s395_s1] sm:$0x7] (!%p139_p2)  ;;  %vm190_vm0 = vcmask (!%p139_p2), 1042432   ;;  %s306_s16 = sshll.u32 (!%p139_p2), %s301_s13, 1  ;;  %v349_v1 = vmov (!%p139_p2), 0.0   ;;  %vm350_vm1 = vmmov (!%p139_p2), 0  }
   0x6   : > { %142 = sbr.rel (%p139_p2) target bundleno = 238 (0xee), region = 32  ;;  %325 = vmatprep.subr.bf16.mxu0 (!%p139_p2), %v349_v1  ;;  %v192_v2 = vsel (!%p139_p2), %vm190_vm0, %v178_v0, 0  ;;  %327 = vmatprep.mubr.msk.bf16.mxu0 (!%p139_p2), %vm350_vm1, %v349_v1  ;;  %p163_p3 = scmp.lt.s32.totalorder (!%p139_p2), %s306_s16, 3  ;;  %vm186_vm2 = vcmask (!%p139_p2), 48128   ;;  %v310_v6 = vld [vmem:[%s396_s2] ss:$0 sm:$0xff] (!%p139_p2) }
   0x7   : > { %326 = vmatpush3.bf16.msra.mxu0 (!%p139_p2), %v192_v2 }
   0xd   : > { %s399_s16 = smov (!%p163_p3, %s306_s16), 3 }
   0xe   : > { %s307_s17 = sshll.u32 %s399_s16, 3  ;;  %s309_s23 = sshll.u32 %s399_s16, 2 }
   0xf   : > { %s166_s20 = scalar_lea.vmem %s394_s0, %s307_s17  ;;  %s172_s26 = scalar_lea.vmem %s397_s3, %s309_s23 }
  0x10   : > { %v175_v3 = vld [vmem:[%s166_s20] sm:$0xff]  ;;  %v176_v4 = vld [vmem:[%s166_s20 + $0x8] sm:$0xff] }
  0x11   : > { %v177_v5 = vpack.c.bf16 %v176_v4, %v175_v3 }
  0x13   : > { %328 = vmatmul.mubr.msk.bf16.vlgmr.msra.gmra.mrb[0].mxu0 %vm186_vm2, %v177_v5 }
  0xe6   : > { %v228_v7 = vpop.f32.mrb[0].mxu0 }
  0xe7   : > { %v329_v8 = vpop.f32.mrb[1].mxu0  ;;  %v229_v10 = vadd.f32 %v310_v6, %v228_v7 }
  0xe8   : > { %v231_v9 = vpop.f32.mrb[2].mxu0 }
  0xe9   : > { %v232_v11 = vadd.f32 %v310_v6, %v231_v9  ;;  %v330_v12 = vpop.f32.mrb[3].mxu0 }
  0xeb   : > { %v321_v13 = vpack.c.bf16 %v232_v11, %v229_v10 }
  0xed   : > { %322 = vst [vmem:[%s172_s26] sm:$0xff] %v321_v13  }
  0xee PF: > { %s13_s12 = sadd.s32 1, %s347_s12  }
  0xef   : > { %p10_p4 = scmp.ge.s32.totalorder %s13_s12, 4  }
  0xf1   :  { %12 = sbr.rel (!%p10_p4) target bundleno = 1 (0x1), region = 62 }

// kernel: surfdm_forward.4
= control target key start
LH: loop header
LB: loop body
LE: loop exit
PB: predicated region body
PF: predicated region fallthrough
CT: control target
= control target key end

     0   :  { %vm35_vm0 = vcmask 1043456   ;;  %vm36_vm1 = vcmask 1044480   ;;  %v103_v0 = vmov 0.0   ;;  %v104_v2 = vmov 65535   ;;  %s138_s1 = inlined_call_operand.vmem [shape: bf16[9,128], index: 1, kind: input, shape index: {}]   ;;  %s139_s0 = inlined_call_operand.vmem [shape: f32[8,9], index: 0, kind: input, shape index: {}]   ;;  %s140_s2 = inlined_call_operand.vmem [shape: f32[1,128], index: 2, kind: input, shape index: {}]   ;;  %s141_s3 = inlined_call_operand.vmem [shape: bf16[8,128], index: 3, kind: output, shape index: {}]  }
   0x1   :  { %93 = vmatprep.subr.bf16.mxu0 %v103_v0  ;;  %v102_v1 = vld [vmem:[%s138_s1] sm:$0x1f]   ;;  %v37_v3 = vsel %vm35_vm0, 4294967295, %v104_v2  ;;  %vm105_vm2 = vmmov 0   ;;  %vm31_vm3 = vcmask 72704  }
   0x2   :  { %v15_v4 = vld [vmem:[%s139_s0] sm:$0xff]  ;;  %v38_v5 = vsel %vm36_vm1, %v37_v3, 0  ;;  %95 = vmatprep.mubr.msk.bf16.mxu0 %vm105_vm2, %v103_v0 }
   0x3   :  { %v40_v6 = vand.u32 %v102_v1, %v38_v5  ;;  %v16_v7 = vpack.c.bf16 %v15_v4, %v15_v4  ;;  %v88_v8 = vld [vmem:[%s140_s2] ss:$0 sm:$0xff] }
   0x5   :  { %94 = vmatpush3.bf16.msra.mxu0 %v40_v6 }
   0x8   :  { %96 = vmatmul.mubr.msk.bf16.vlgmr.msra.gmra.mrb[0].mxu0 %vm31_vm3, %v16_v7 }
  0xdb   :  { %v76_v9 = vpop.f32.mrb[0].mxu0 }
  0xdc   :  { %v77_v10 = vadd.f32 %v88_v8, %v76_v9  ;;  %v97_v11 = vpop.f32.mrb[1].mxu0 }
  0xdd   :  { %v79_v12 = vpop.f32.mrb[2].mxu0 }
  0xde   :  { %v82_v13 = vpack.c.bf16 %v77_v10, %v77_v10  ;;  %v98_v14 = vpop.f32.mrb[3].mxu0 }
  0xe0   :  { %83 = vst [vmem:[%s141_s3] sm:$0xf] %v82_v13 }

// kernel: surfdm_forward.5
= control target key start
LH: loop header
LB: loop body
LE: loop exit
PB: predicated region body
PF: predicated region fallthrough
CT: control target
= control target key end

     0   :  { %s2684_s0 = inlined_call_operand.vmem [shape: f32[32,3], index: 0, kind: input, shape index: {}]   ;;  %s2685_s1 = inlined_call_operand.vmem [shape: bf16[32,128], index: 1, kind: input, shape index: {}]   ;;  %s2686_s2 = inlined_call_operand.vmem [shape: f32[3,16], index: 2, kind: input, shape index: {}]   ;;  %s2687_s3 = inlined_call_operand.vmem [shape: f32[1,16], index: 3, kind: input, shape index: {}]   ;;  %s2688_s4 = inlined_call_operand.vmem [shape: f32[16,16], index: 4, kind: input, shape index: {}]   ;;  %s2689_s5 = inlined_call_operand.vmem [shape: f32[1,16], index: 5, kind: input, shape index: {}]   ;;  %s2690_s6 = inlined_call_operand.vmem [shape: f32[16,128], index: 6, kind: input, shape index: {}]   ;;  %s2691_s7 = inlined_call_operand.vmem [shape: f32[1,128], index: 7, kind: input, shape index: {}]   ;;  %s2692_s8 = inlined_call_operand.vmem [shape: bf16[128,256], index: 8, kind: input, shape index: {}]   ;;  %s2693_s9 = inlined_call_operand.vmem [shape: f32[1,256], index: 9, kind: input, shape index: {}]   ;;  %s2694_s10 = inlined_call_operand.vmem [shape: bf16[256,256], index: 10, kind: input, shape index: {}]   ;;  %s2695_s11 = inlined_call_operand.vmem [shape: f32[1,256], index: 11, kind: input, shape index: {}]   ;;  %s2696_s12 = inlined_call_operand.vmem [shape: bf16[256,128], index: 12, kind: input, shape index: {}]   ;;  %s2697_s13 = inlined_call_operand.vmem [shape: f32[1,128], index: 13, kind: input, shape index: {}]   ;;  %s2698_s14 = inlined_call_operand.vmem [shape: bf16[128,128], index: 14, kind: input, shape index: {}]   ;;  %s2699_s15 = inlined_call_operand.vmem [shape: f32[1,128], index: 15, kind: input, shape index: {}]   ;;  %s2700_s16 = inlined_call_operand.vmem [shape: bf16[128,128], index: 16, kind: input, shape index: {}]   ;;  %s2701_s17 = inlined_call_operand.vmem [shape: f32[1,128], index: 17, kind: input, shape index: {}]   ;;  %s2702_s18 = inlined_call_operand.vmem [shape: f32[32,128], index: 18, kind: output, shape index: {0}]   ;;  %s2703_s19 = inlined_call_operand.vmem [shape: f32[32,128], index: 19, kind: output, shape index: {1}]  }
   0x1   :  { %2704 = sst [smem:[#allocation2_spill]] %s2684_s0  ;;  %s2340_s0 = smov 0  }
   0x2   :  { %2705 = sst [smem:[#allocation3_spill]] %s2685_s1 }
   0x3   :  { %2706 = sst [smem:[#allocation4_spill]] %s2686_s2 }
   0x4   :  { %2707 = sst [smem:[#allocation5_spill]] %s2687_s3 }
   0x5 LB: > { %s1876_s30 = sadd.s32 4294967295, %s2235_s0   ;;  %p1880_p0 = scmp.ge.s32.totalorder %s2235_s0, 1  ;;  %s2235_s0 = sphi %s2340_s0, %s30_s0  }
   0x6   : > { %p552_p1 = scmp.lt.s32.totalorder %s2235_s0, 3 }
   0x8   : > { %p553_p2 = pnand %p1880_p0, %p552_p1 }
   0x9   : > { %s2708_s1 = sld [smem:[#allocation4_spill]] (!%p553_p2)  ;;  %vm660_vm0 = vcmask (!%p553_p2), 1042432   ;;  %s1881_s22 = sshll.u32 (!%p553_p2), %s1876_s30, 1  ;;  %vm653_vm1 = vcmask (!%p553_p2), 23552   ;;  %v739_v3 = vld [vmem:[%s2688_s4] sm:$0xff] (!%p553_p2)  ;;  %v740_v4 = vld [vmem:[%s2688_s4 + $0x8] sm:$0xff] (!%p553_p2)  ;;  %v942_v46 = vlaneseq (!%p553_p2) }
   0xa   : > { %556 = sbr.rel (%p553_p2) target bundleno = 1432 (0x598), region = 92  ;;  %p619_p3 = scmp.lt.s32.totalorder (!%p553_p2), %s1881_s22, 3  ;;  %v2097_v5 = vpack.c.bf16 (!%p553_p2), %v740_v4, %v739_v3  ;;  %v2118_v6 = vld [vmem:[%s2692_s8 + $0x4] ss:$8 sps:$4 sm:$0xff] (!%p553_p2)   ;;  %vm748_vm2 = vcmask (!%p553_p2), 130048   ;;  %v2237_v15 = vmov (!%p553_p2), 0  }
   0xb   : > { %s2709_s3 = sld [smem:[#allocation2_spill]] (!%p553_p2)  ;;  %s2710_s29 = sld [smem:[#allocation3_spill]] (!%p553_p2)  ;;  %v2116_v11 = vld [vmem:[%s2692_s8] ss:$8 sps:$4 sm:$0xff] (!%p553_p2)   ;;  %v2121_v13 = vld [vmem:[%s2692_s8 + $0x14] ss:$8 sps:$4 sm:$0xff] (!%p553_p2)  }
   0xc   : > { %2098 = vmatprep.subr.bf16.mxu1 (!%p553_p2), %v2097_v5  ;;  %v2119_v14 = vld [vmem:[%s2692_s8 + $0x10] ss:$8 sps:$4 sm:$0xff] (!%p553_p2)   ;;  %v2124_v16 = vld [vmem:[%s2692_s8 + $0x24] ss:$8 sps:$4 sm:$0xff] (!%p553_p2)   ;;  %v2122_v17 = vld [vmem:[%s2692_s8 + $0x20] ss:$8 sps:$4 sm:$0xff] (!%p553_p2)  }
   0xd   : > { %2100 = vmatpush3.bf16.msra.mxu1 (!%p553_p2), %v2097_v5  ;;  %v2127_v18 = vld [vmem:[%s2692_s8 + $0x34] ss:$8 sps:$4 sm:$0xff] (!%p553_p2)   ;;  %v2125_v19 = vld [vmem:[%s2692_s8 + $0x30] ss:$8 sps:$4 sm:$0xff] (!%p553_p2)   ;;  %v2130_v20 = vld [vmem:[%s2692_s8 + $0x44] ss:$8 sps:$4 sm:$0xff] (!%p553_p2)  }
   0xe   : > { %1038 = vmatprep.subr.bf16.mxu1 (!%p553_p2), %v2118_v6  ;;  %v2128_v21 = vld [vmem:[%s2692_s8 + $0x40] ss:$8 sps:$4 sm:$0xff] (!%p553_p2)   ;;  %v2133_v22 = vld [vmem:[%s2692_s8 + $0x54] ss:$8 sps:$4 sm:$0xff] (!%p553_p2)   ;;  %v2131_v23 = vld [vmem:[%s2692_s8 + $0x50] ss:$8 sps:$4 sm:$0xff] (!%p553_p2)  }
   0xf   : > { %v645_v0 = vld [vmem:[%s2708_s1] sm:$0x7] (!%p553_p2)  ;;  %v2136_v24 = vld [vmem:[%s2692_s8 + $0x64] ss:$8 sps:$4 sm:$0xff] (!%p553_p2)   ;;  %v2139_v26 = vld [vmem:[%s2692_s8 + $0x74] ss:$8 sps:$4 sm:$0xff] (!%p553_p2)  }
  0x10   : > { %2038 = vmatprep.subr.msk.mxu0 (!%p553_p2), %vm660_vm0, %v645_v0  ;;  %v2134_v25 = vld [vmem:[%s2692_s8 + $0x60] ss:$8 sps:$4 sm:$0xff] (!%p553_p2)   ;;  %v2137_v27 = vld [vmem:[%s2692_s8 + $0x70] ss:$8 sps:$4 sm:$0xff] (!%p553_p2)   ;;  %v2143_v32 = vld [vmem:[%s2694_s10 + $0x4] ss:$8 sps:$4 sm:$0xff] (!%p553_p2)  }
  0x11   : > { %2039 = vmatpush3.msk.msra.mxu0 %vm660_vm0, %v645_v0  ;;  %s2713_s22 = smov (!%p619_p3, %s1881_s22), 3  ;;  %v830_v29 = vld [vmem:[%s2690_s6] sm:$0xff]  ;;  %v831_v30 = vld [vmem:[%s2690_s6 + $0x8] sm:$0xff]  ;;  %v2146_v39 = vld [vmem:[%s2694_s10 + $0x14] ss:$8 sps:$4 sm:$0xff]   ;;  %v2466_v49 = vshrl.u32 %v942_v46, 7 }
  0x12   : > { %s2351_s2 = sshll.u32 %s2713_s22, 3  ;;  %s1884_s23 = sshll.u32 %s2713_s22, 2  ;;  %v2101_v31 = vpack.c.bf16 %v831_v30, %v830_v29  ;;  %v1893_v33 = vld [vmem:[%s2689_s5] ss:$0 sm:$0xff]  ;;  %v2144_v40 = vld [vmem:[%s2694_s10 + $0x10] ss:$8 sps:$4 sm:$0xff]  }
  0x13   : > { %s622_s26 = scalar_lea.vmem %s2709_s3, %s2351_s2  ;;  %s2360_s20 = scalar_lea.vmem %s2710_s29, %s1884_s23  ;;  %v2141_v37 = vld [vmem:[%s2694_s10] ss:$8 sps:$4 sm:$0xff]   ;;  %v2149_v41 = vld [vmem:[%s2694_s10 + $0x24] ss:$8 sps:$4 sm:$0xff]   ;;  %v2152_v43 = vld [vmem:[%s2694_s10 + $0x34] ss:$8 sps:$4 sm:$0xff]  }
  0x14   : > { %v643_v1 = vld [vmem:[%s622_s26] sm:$0xff]  ;;  %v644_v2 = vld [vmem:[%s622_s26 + $0x8] sm:$0xff]  ;;  %s2711_s26 = sld [smem:[#allocation5_spill]]  ;;  %2102 = vmatprep.subr.bf16.mxu0 %v2101_v31  ;;  %v2150_v44 = vld [vmem:[%s2694_s10 + $0x30] ss:$8 sps:$4 sm:$0xff]   ;;  %v944_v52 = vsub.s32 0, %v2466_v49  ;;  %s634_s3 = scalar_lea.vmem %s2702_s18, %s2351_s2 }
  0x15   : > { %2040 = vmatprep.mubr.msk.f32.mxu0 %vm653_vm1, %v643_v1  ;;  %v2140_v28 = vld [vmem:[%s2360_s20] sm:$0xff]   ;;  %v2158_v48 = vld [vmem:[%s2694_s10 + $0x54] ss:$8 sps:$4 sm:$0xff]   ;;  %v2156_v50 = vld [vmem:[%s2694_s10 + $0x50] ss:$8 sps:$4 sm:$0xff]   ;;  %v948_v55 = vsub.s32 1, %v2466_v49  ;;  %s640_s28 = scalar_lea.vmem %s2703_s19, %s2351_s2 }
  0x16   : > { %2041 = vmatmul.mubr.msk.f32.vlgmr.msra.gmra.mrb[0].mxu0 %vm653_vm1, %v644_v2  ;;  %v2147_v42 = vld [vmem:[%s2694_s10 + $0x20] ss:$8 sps:$4 sm:$0xff]   ;;  %v2155_v45 = vld [vmem:[%s2694_s10 + $0x44] ss:$8 sps:$4 sm:$0xff]   ;;  %v2164_v56 = vld [vmem:[%s2694_s10 + $0x74] ss:$8 sps:$4 sm:$0xff]  }
  0x17   : > { %2104 = vmatpush3.bf16.msra.mxu0 %v2101_v31  ;;  %v2153_v47 = vld [vmem:[%s2694_s10 + $0x40] ss:$8 sps:$4 sm:$0xff]   ;;  %v2161_v51 = vld [vmem:[%s2694_s10 + $0x64] ss:$8 sps:$4 sm:$0xff]   ;;  %v2162_v58 = vld [vmem:[%s2694_s10 + $0x70] ss:$8 sps:$4 sm:$0xff]  }
  0x18   : > { %1287 = vmatprep.subr.bf16.mxu0 %v2143_v32  ;;  %v2159_v53 = vld [vmem:[%s2694_s10 + $0x60] ss:$8 sps:$4 sm:$0xff]   ;;  %v2167_v60 = vld [vmem:[%s2694_s10 + $0x84] ss:$8 sps:$4 sm:$0xff]   ;;  %v2170_v3 = vld [vmem:[%s2694_s10 + $0x94] ss:$8 sps:$4 sm:$0xff]  }
  0x19   : > { %v940_v54 = vld [vmem:[%s2693_s9] sm:$0x3]  ;;  %v2196_v29 = vld [vmem:[%s2696_s12 + $0x18] sm:$0xff]   ;;  %v2199_v32 = vld [vmem:[%s2696_s12 + $0x68] sm:$0xff]   ;;  %vm2239_vm3 = vmmov 0  }
  0x1a   : > { %v1889_v7 = vld [vmem:[%s2711_s26] ss:$0 sm:$0xff]  ;;  %v945_v57 = vrot.slane %v940_v54, %v944_v52  ;;  %v949_v59 = vrot.slane %v940_v54, %v948_v55  ;;  %v2206_v49 = vld [vmem:[%s2698_s14 + $0x8] sm:$0xff]  }
  0x1b   : > { %v2165_v0 = vld [vmem:[%s2694_s10 + $0x80] ss:$8 sps:$4 sm:$0xff]  }
  0x1c   : > { %v2197_v30 = vld [vmem:[%s2696_s12 + $0x60] sm:$0xff]  }
  0x1d   : > { %v2198_v31 = vld [vmem:[%s2696_s12 + $0x20] sm:$0xff]  }
  0xe9   : > { %v2042_v8 = vpop.f32.mrb[0].mxu0 }
  0xea   : > { %v730_v9 = vpop.f32.mrb[1].mxu0  ;;  %v736_v12 = vadd.f32 %v2042_v8, %v1889_v7  ;;  %v2168_v8 = vld [vmem:[%s2694_s10 + $0x90] ss:$8 sps:$4 sm:$0xff]  }
  0xeb   : > { %v731_v10 = vadd.f32 %v1889_v7, %v730_v9 }
  0xed   : > { %2047 = vmatprep.mubr.msk.f32.mxu1 %vm748_vm2, %v731_v10  ;;  %v2173_v10 = vld [vmem:[%s2694_s10 + $0xa4] ss:$8 sps:$4 sm:$0xff]  }
  0xee   : > { %2048 = vmatmul.mubr.msk.f32.vlgmr.msra.gmra.mrb[0].mxu1 %vm748_vm2, %v736_v12  ;;  %v2176_v12 = vld [vmem:[%s2694_s10 + $0xb4] ss:$8 sps:$4 sm:$0xff]  }
  0xef   : > { %1039 = vmatpush1.bf16.msra.mxu1 %v2116_v11  ;;  %1070 = vmatprep.mubr.bf16.mxu1 %v2237_v15  ;;  %v2171_v11 = vld [vmem:[%s2694_s10 + $0xa0] ss:$8 sps:$4 sm:$0xff]  }
  0xf0   : > { %1040 = vmatprep.subr.bf16.mxu1 %v2121_v13  ;;  %v2174_v13 = vld [vmem:[%s2694_s10 + $0xb0] ss:$8 sps:$4 sm:$0xff]   ;;  %v2177_v15 = vld [vmem:[%s2694_s10 + $0xc0] ss:$8 sps:$4 sm:$0xff]  }
  0xf3   : > { %1041 = vmatpush1.bf16.msra.mxu1 %v2119_v14  ;;  %v2179_v14 = vld [vmem:[%s2694_s10 + $0xc4] ss:$8 sps:$4 sm:$0xff]  }
  0xf4   : > { %1042 = vmatprep.subr.bf16.mxu1 %v2124_v16  ;;  %v2182_v16 = vld [vmem:[%s2694_s10 + $0xd4] ss:$8 sps:$4 sm:$0xff]  }
  0xf7   : > { %1043 = vmatpush1.bf16.msra.mxu1 %v2122_v17  ;;  %v2180_v17 = vld [vmem:[%s2694_s10 + $0xd0] ss:$8 sps:$4 sm:$0xff]  }
  0xf8   : > { %1044 = vmatprep.subr.bf16.mxu1 %v2127_v18  ;;  %v2185_v18 = vld [vmem:[%s2694_s10 + $0xe4] ss:$8 sps:$4 sm:$0xff]  }
  0xfb   : > { %1045 = vmatpush1.bf16.msra.mxu1 %v2125_v19  ;;  %v2183_v19 = vld [vmem:[%s2694_s10 + $0xe0] ss:$8 sps:$4 sm:$0xff]  }
  0xfc   : > { %1046 = vmatprep.subr.bf16.mxu1 %v2130_v20  ;;  %v2188_v20 = vld [vmem:[%s2694_s10 + $0xf4] ss:$8 sps:$4 sm:$0xff]  }
  0xff   : > { %1047 = vmatpush1.bf16.msra.mxu1 %v2128_v21  ;;  %v2186_v21 = vld [vmem:[%s2694_s10 + $0xf0] ss:$8 sps:$4 sm:$0xff]  }
 0x100   : > { %1048 = vmatprep.subr.bf16.mxu1 %v2133_v22  ;;  %v2189_v22 = vld [vmem:[%s2696_s12 + $0x40] sm:$0xff]  }
 0x103   : > { %1049 = vmatpush1.bf16.msra.mxu1 %v2131_v23  ;;  %v2190_v23 = vld [vmem:[%s2696_s12] sm:$0xff]  }
 0x104   : > { %1050 = vmatprep.subr.bf16.mxu1 %v2136_v24  ;;  %v2191_v24 = vld [vmem:[%s2696_s12 + $0x48] sm:$0xff]  }
 0x107   : > { %1051 = vmatpush1.bf16.msra.mxu1 %v2134_v25  ;;  %v2192_v25 = vld [vmem:[%s2696_s12 + $0x8] sm:$0xff]  }
 0x108   : > { %1052 = vmatprep.subr.bf16.mxu1 %v2139_v26  ;;  %v2193_v26 = vld [vmem:[%s2696_s12 + $0x50] sm:$0xff]  }
 0x10b   : > { %1053 = vmatpush1.bf16.msra.mxu1 %v2137_v27  ;;  %v2194_v27 = vld [vmem:[%s2696_s12 + $0x10] sm:$0xff]  }
 0x10c   : > { %1998 = vmatprep.subr.bf16.mxu1 %v2189_v22 }
 0x10e   : > { %1071 = vmatmul.mubr.bf16.vlgmr.msra.gmra.mrb[4].mxu1 %v2140_v28  ;;  %v2195_v28 = vld [vmem:[%s2696_s12 + $0x58] sm:$0xff]  }
 0x10f   : > { %1999 = vmatpush3.bf16.msra.mxu1 %v2190_v23 }
 0x110   : > { %2000 = vmatprep.subr.bf16.mxu1 %v2191_v24 }
 0x113   : > { %2001 = vmatpush3.bf16.msra.mxu1 %v2192_v25 }
 0x114   : > { %2002 = vmatprep.subr.bf16.mxu1 %v2193_v26 }
 0x117   : > { %2003 = vmatpush3.bf16.msra.mxu1 %v2194_v27 }
 0x118   : > { %2004 = vmatprep.subr.bf16.mxu1 %v2195_v28 }
 0x11b   : > { %2005 = vmatpush3.bf16.msra.mxu1 %v2196_v29 }
 0x11c   : > { %2006 = vmatprep.subr.bf16.mxu1 %v2197_v30 }
 0x11f   : > { %2007 = vmatpush3.bf16.msra.mxu1 %v2198_v31 }
 0x120   : > { %2008 = vmatprep.subr.bf16.mxu1 %v2199_v32 }
 0x1c1   : > { %v2049_v34 = vpop.f32.mrb[0].mxu1 }
 0x1c2   : > { %v821_v35 = vpop.f32.mrb[1].mxu1  ;;  %v827_v38 = vadd.f32 %v2049_v34, %v1893_v33  ;;  %v2201_v34 = vld [vmem:[%s2696_s12 + $0x70] sm:$0xff]  }
 0x1c3   : > { %v822_v36 = vadd.f32 %v1893_v33, %v821_v35  ;;  %v2200_v33 = vld [vmem:[%s2696_s12 + $0x28] sm:$0xff]   ;;  %v2202_v35 = vld [vmem:[%s2696_s12 + $0x30] sm:$0xff]  }
 0x1c4   : > { %2009 = vmatpush3.bf16.msra.mxu1 %v2200_v33 }
 0x1c5   : > { %2054 = vmatprep.mubr.msk.f32.mxu0 %vm748_vm2, %v822_v36  ;;  %2010 = vmatprep.subr.bf16.mxu1 %v2201_v34  ;;  %v2203_v36 = vld [vmem:[%s2696_s12 + $0x78] sm:$0xff]  }
 0x1c6   : > { %2055 = vmatmul.mubr.msk.f32.vlgmr.msra.gmra.mrb[2].mxu0 %vm748_vm2, %v827_v38  ;;  %v2238_v38 = vmov 0.0  }
 0x1c7   : > { %1288 = vmatpush1.bf16.msra.mxu0 %v2141_v37  ;;  %v2204_v37 = vld [vmem:[%s2696_s12 + $0x38] sm:$0xff]  }
 0x1c8   : > { %1289 = vmatprep.subr.bf16.mxu0 %v2146_v39  ;;  %2011 = vmatpush3.bf16.msra.mxu1 %v2202_v35  ;;  %v1896_v39 = vld [vmem:[%s2691_s7] ss:$0 sm:$0xff] }
 0x1c9   : > { %2012 = vmatprep.subr.bf16.mxu1 %v2203_v36 }
 0x1cb   : > { %1290 = vmatpush1.bf16.msra.mxu0 %v2144_v40 }
 0x1cc   : > { %1291 = vmatprep.subr.bf16.mxu0 %v2149_v41  ;;  %2013 = vmatpush3.bf16.msra.mxu1 %v2204_v37 }
 0x1cd   : > { %2057 = vmatprep.subr.bf16.mxu1 %v2238_v38 }
 0x1cf   : > { %1292 = vmatpush1.bf16.msra.mxu0 %v2147_v42 }
 0x1d0   : > { %1293 = vmatprep.subr.bf16.mxu0 %v2152_v43 }
 0x1d3   : > { %1294 = vmatpush1.bf16.msra.mxu0 %v2150_v44  ;;  %v1115_v44 = vld [vmem:[%s2695_s11] sm:$0x3] }
 0x1d4   : > { %1295 = vmatprep.subr.bf16.mxu0 %v2155_v45  ;;  %v1120_v45 = vrot.slane %v1115_v44, %v944_v52  ;;  %v2207_v52 = vld [vmem:[%s2698_s14 + $0x10] sm:$0xff]  }
 0x1d7   : > { %1296 = vmatpush1.bf16.msra.mxu0 %v2153_v47  ;;  %v1124_v47 = vrot.slane %v1115_v44, %v948_v55  ;;  %v2208_v55 = vld [vmem:[%s2698_s14 + $0x18] sm:$0xff]  }
 0x1d8   : > { %1297 = vmatprep.subr.bf16.mxu0 %v2158_v48 }
 0x1db   : > { %1298 = vmatpush1.bf16.msra.mxu0 %v2156_v50 }
 0x1dc   : > { %1299 = vmatprep.subr.bf16.mxu0 %v2161_v51 }
 0x1df   : > { %1300 = vmatpush1.bf16.msra.mxu0 %v2159_v53 }
 0x1e0   : > { %1301 = vmatprep.subr.bf16.mxu0 %v2164_v56 }
 0x1e1   : > { %v1072_v61 = vpop.f32.mrb[4].mxu1 }
 0x1e2   : > { %v1073_v62 = vadd.f32 %v1072_v61, %v945_v57  ;;  %v1074_v63 = vpop.f32.mrb[5].mxu1  ;;  %v2209_v61 = vld [vmem:[%s2698_s14 + $0x20] sm:$0xff]  }
 0x1e3   : > { %1302 = vmatpush1.bf16.msra.mxu0 %v2162_v58  ;;  %v1075_v1 = vadd.f32 %v1074_v63, %v949_v59  ;;  %v1076_v2 = vpop.f32.mrb[6].mxu1  ;;  %v2211_v63 = vld [vmem:[%s2698_s14 + $0x30] sm:$0xff]  }
 0x1e4   : > { %1303 = vmatprep.subr.bf16.mxu0 %v2167_v60  ;;  %v1077_v4 = vadd.f32 %v1076_v2, %v945_v57  ;;  %v1078_v5 = vpop.f32.mrb[7].mxu1  ;;  %v2205_v60 = vld [vmem:[%s2698_s14] sm:$0xff]  }
 0x1e5   : > { %v1079_v6 = vadd.f32 %v1078_v5, %v949_v59  ;;  %v1948_v5 = vld [vmem:[%s2697_s13] ss:$0 sm:$0xff] }
 0x1e6   : > { %v1081_v7 = vpack.c.bf16 %v1077_v4, %v1073_v62  ;;  %v2210_v62 = vld [vmem:[%s2698_s14 + $0x28] sm:$0xff]  }
 0x1e7   : > { %1304 = vmatpush1.bf16.msra.mxu0 %v2165_v0  ;;  %v1082_v9 = vpack.c.bf16 %v1079_v6, %v1075_v1  ;;  %v2212_v0 = vld [vmem:[%s2698_s14 + $0x38] sm:$0xff]  }
 0x1e8   : > { %1305 = vmatprep.subr.bf16.mxu0 %v2170_v3 }
 0x1e9   : > { %1319 = vmatprep.mubr.bf16.mxu0 %v1082_v9 }
 0x1eb   : > { %1306 = vmatpush1.bf16.msra.mxu0 %v2168_v8 }
 0x1ec   : > { %1307 = vmatprep.subr.bf16.mxu0 %v2173_v10 }
 0x1ef   : > { %1308 = vmatpush1.bf16.msra.mxu0 %v2171_v11  ;;  %v2213_v11 = vld [vmem:[%s2700_s16] sm:$0xff]  }
 0x1f0   : > { %1309 = vmatprep.subr.bf16.mxu0 %v2176_v12  ;;  %v2214_v12 = vld [vmem:[%s2700_s16 + $0x8] sm:$0xff]  }
 0x1f3   : > { %1310 = vmatpush1.bf16.msra.mxu0 %v2174_v13  ;;  %v2215_v13 = vld [vmem:[%s2700_s16 + $0x10] sm:$0xff]  }
 0x1f4   : > { %1311 = vmatprep.subr.bf16.mxu0 %v2179_v14  ;;  %v2216_v14 = vld [vmem:[%s2700_s16 + $0x18] sm:$0xff]  }
 0x1f7   : > { %1312 = vmatpush1.bf16.msra.mxu0 %v2177_v15  ;;  %v2217_v15 = vld [vmem:[%s2700_s16 + $0x20] sm:$0xff]  }
 0x1f8   : > { %1313 = vmatprep.subr.bf16.mxu0 %v2182_v16  ;;  %v2218_v16 = vld [vmem:[%s2700_s16 + $0x28] sm:$0xff]  }
 0x1fb   : > { %1314 = vmatpush1.bf16.msra.mxu0 %v2180_v17  ;;  %v2219_v17 = vld [vmem:[%s2700_s16 + $0x30] sm:$0xff]  }
 0x1fc   : > { %1315 = vmatprep.subr.bf16.mxu0 %v2185_v18  ;;  %v2220_v18 = vld [vmem:[%s2700_s16 + $0x38] sm:$0xff]  }
 0x1ff   : > { %1316 = vmatpush1.bf16.msra.mxu0 %v2183_v19  ;;  %v1965_v19 = vld [vmem:[%s2699_s15] ss:$0 sm:$0xff] }
 0x200   : > { %1317 = vmatprep.subr.bf16.mxu0 %v2188_v20 }
 0x203   : > { %1318 = vmatpush1.bf16.msra.mxu0 %v2186_v21 }
 0x204   : > { %2077 = vmatprep.subr.bf16.mxu0 %v2238_v38 }
 0x206   : > { %1320 = vmatmul.mubr.bf16.vlgmr.msra.gmra.mrb[4].mxu0 %v1081_v7 }
 0x207   : > { %2093 = vmatprep.mubr.msk.bf16.mxu0 %vm2239_vm3, %v2238_v38  ;;  %2078 = vmatpush3.bf16.msra.mxu0 %v2213_v11 }
 0x208   : > { %2079 = vmatprep.subr.bf16.mxu0 %v2238_v38 }
 0x20b   : > { %2080 = vmatpush3.bf16.msra.mxu0 %v2214_v12 }
 0x20c   : > { %2081 = vmatprep.subr.bf16.mxu0 %v2238_v38 }
 0x20f   : > { %2082 = vmatpush3.bf16.msra.mxu0 %v2215_v13 }
 0x210   : > { %2083 = vmatprep.subr.bf16.mxu0 %v2238_v38 }
 0x213   : > { %2084 = vmatpush3.bf16.msra.mxu0 %v2216_v14 }
 0x214   : > { %2085 = vmatprep.subr.bf16.mxu0 %v2238_v38 }
 0x217   : > { %2086 = vmatpush3.bf16.msra.mxu0 %v2217_v15 }
 0x218   : > { %2087 = vmatprep.subr.bf16.mxu0 %v2238_v38 }
 0x21b   : > { %2088 = vmatpush3.bf16.msra.mxu0 %v2218_v16 }
 0x21c   : > { %2089 = vmatprep.subr.bf16.mxu0 %v2238_v38 }
 0x21f   : > { %2090 = vmatpush3.bf16.msra.mxu0 %v2219_v17 }
 0x220   : > { %2091 = vmatprep.subr.bf16.mxu0 %v2238_v38 }
 0x223   : > { %2092 = vmatpush3.bf16.msra.mxu0 %v2220_v18 }
 0x299   : > { %v2056_v40 = vpop.f32.mrb[2].mxu0 }
 0x29a   : > { %v911_v41 = vpop.f32.mrb[3].mxu0  ;;  %v917_v43 = vadd.f32 %v2056_v40, %v1896_v39 }
 0x29b   : > { %v912_v42 = vadd.f32 %v1896_v39, %v911_v41 }
 0x29c   : > { %921 = vst [vmem:[%s634_s3 + $0x8] sm:$0xff] %v917_v43 }
 0x29d   : > { %920 = vst [vmem:[%s634_s3] sm:$0xff] %v912_v42 }
 0x2d9   : > { %v1321_v46 = vpop.f32.mrb[4].mxu0 }
 0x2da   : > { %v1323_v48 = vpop.f32.mrb[5].mxu0  ;;  %v1322_v51 = vadd.f32 %v1321_v46, %v1120_v45 }
 0x2db   : > { %v1325_v50 = vpop.f32.mrb[6].mxu0  ;;  %v1324_v56 = vadd.f32 %v1323_v48, %v1124_v47 }
 0x2dc   : > { %v1326_v53 = vadd.f32 %v1325_v50, %v1120_v45  ;;  %v1327_v54 = vpop.f32.mrb[7].mxu0 }
 0x2dd   : > { %v1328_v57 = vadd.f32 %v1327_v54, %v1124_v47 }
 0x2de   : > { %v1330_v58 = vpack.c.bf16 %v1326_v53, %v1322_v51 }
 0x2df   : > { %v1331_v59 = vpack.c.bf16 %v1328_v57, %v1324_v56 }
 0x2e1   : > { %1499 = vmatprep.mubr.bf16.mxu1 %v1331_v59 }
 0x2e2   : > { %1500 = vmatmul.mubr.bf16.vlgmr.msra.gmra.mrb[8].mxu1 %v1330_v58 }
 0x2e3   : > { %2058 = vmatpush3.bf16.msra.mxu1 %v2205_v60  ;;  %2073 = vmatprep.mubr.msk.bf16.mxu1 %vm2239_vm3, %v2238_v38 }
 0x2e4   : > { %2059 = vmatprep.subr.bf16.mxu1 %v2238_v38 }
 0x2e7   : > { %2060 = vmatpush3.bf16.msra.mxu1 %v2206_v49 }
 0x2e8   : > { %2061 = vmatprep.subr.bf16.mxu1 %v2238_v38 }
 0x2eb   : > { %2062 = vmatpush3.bf16.msra.mxu1 %v2207_v52  ;;  %v1976_v52 = vld [vmem:[%s2701_s17] ss:$0 sm:$0xff] }
 0x2ec   : > { %2063 = vmatprep.subr.bf16.mxu1 %v2238_v38 }
 0x2ef   : > { %2064 = vmatpush3.bf16.msra.mxu1 %v2208_v55 }
 0x2f0   : > { %2065 = vmatprep.subr.bf16.mxu1 %v2238_v38 }
 0x2f3   : > { %2066 = vmatpush3.bf16.msra.mxu1 %v2209_v61 }
 0x2f4   : > { %2067 = vmatprep.subr.bf16.mxu1 %v2238_v38 }
 0x2f7   : > { %2068 = vmatpush3.bf16.msra.mxu1 %v2210_v62 }
 0x2f8   : > { %2069 = vmatprep.subr.bf16.mxu1 %v2238_v38 }
 0x2fb   : > { %2070 = vmatpush3.bf16.msra.mxu1 %v2211_v63 }
 0x2fc   : > { %2071 = vmatprep.subr.bf16.mxu1 %v2238_v38 }
 0x2ff   : > { %2072 = vmatpush3.bf16.msra.mxu1 %v2212_v0 }
 0x3b5   : > { %v2014_v1 = vpop.f32.mrb[8].mxu1 }
 0x3b6   : > { %v2015_v2 = vpop.f32.mrb[9].mxu1 }
 0x3b7   : > { %v2016_v3 = vadd.f32 %v2015_v2, %v2014_v1  ;;  %v2017_v4 = vpop.f32.mrb[10].mxu1 }
 0x3b8   : > { %v2018_v6 = vpop.f32.mrb[11].mxu1 }
 0x3b9   : > { %v2019_v7 = vadd.f32 %v2018_v6, %v2017_v4  ;;  %v1502_v8 = vadd.f32 %v2016_v3, %v1948_v5 }
 0x3bb   : > { %v1505_v9 = vadd.f32 %v2019_v7, %v1948_v5 }
 0x3bd   : > { %v1508_v10 = vpack.c.bf16 %v1505_v9, %v1502_v8 }
 0x3bf   : > { %2074 = vmatmul.mubr.bf16.vlgmr.msra.gmra.mrb[12].mxu1 %v1508_v10 }
 0x492   : > { %v1614_v20 = vpop.f32.mrb[12].mxu1 }
 0x493   : > { %v1615_v21 = vadd.f32 %v1965_v19, %v1614_v20  ;;  %v2075_v22 = vpop.f32.mrb[13].mxu1 }
 0x494   : > { %v1617_v23 = vpop.f32.mrb[14].mxu1 }
 0x495   : > { %v1627_v24 = vand.u32 2147483647, %v1615_v21  ;;  %v1618_v25 = vadd.f32 %v1965_v19, %v1617_v23  ;;  %v2076_v26 = vpop.f32.mrb[15].mxu1  ;;  %v1621_v46 = vmax.f32 %v1615_v21, 0.0  ;;  %vm1623_vm6 = vcmp.ne.f32.partialorder %v1615_v21, %v1615_v21 }
 0x497   : > { %v1629_v27 = vsub.f32 0.0, %v1627_v24  ;;  %v1628_v28 = vand.u32 2147483647, %v1618_v25  ;;  %v1622_v53 = vmax.f32 %v1618_v25, 0.0  ;;  %vm1624_vm7 = vcmp.ne.f32.partialorder %v1618_v25, %v1618_v25 }
 0x499   : > { %v1631_v29 = vmul.f32 1.442695, %v1629_v27  ;;  %v1630_v30 = vsub.f32 0.0, %v1628_v28 }
 0x49b   : > { %2221 = vpow2.f32 %v1631_v29  ;;  %v1633_v31 = vmul.f32 1.442695, %v1630_v30 }
 0x49d   : > { %2223 = vpow2.f32 %v1633_v31 }
 0x4a5   : > { %v2222_v32 = vpop.eup %2221 }
 0x4a6   : > { %v1635_v33 = vadd.f32 1.0, %v2222_v32  ;;  %v1638_v36 = vmul.f32 -0.5, %v2222_v32  ;;  %v1641_v39 = vand.u32 2147483647, %v2222_v32 }
 0x4a7   : > { %v2224_v34 = vpop.eup %2223 }
 0x4a8   : > { %2225 = vlog2.f32 %v1635_v33  ;;  %v1644_v35 = vadd.f32 1.0, %v2224_v34  ;;  %v1647_v37 = vmul.f32 -0.5, %v2224_v34  ;;  %v1639_v38 = vadd.f32 1.0, %v1638_v36 }
 0x4a9   : > { %v1650_v42 = vand.u32 2147483647, %v2224_v34  ;;  %vm1642_vm4 = vcmp.lt.f32.partialorder %v1641_v39, 0.0004427343 }
 0x4aa   : > { %2227 = vlog2.f32 %v1644_v35  ;;  %v1648_v40 = vadd.f32 1.0, %v1647_v37  ;;  %v1640_v44 = vmul.f32 %v2222_v32, %v1639_v38 }
 0x4ab   : > { %vm1651_vm5 = vcmp.lt.f32.partialorder %v1650_v42, 0.0004427343 }
 0x4ac   : > { %v1649_v50 = vmul.f32 %v2224_v34, %v1648_v40 }
 0x4b2   : > { %v2226_v41 = vpop.eup %2225 }
 0x4b3   : > { %v1637_v43 = vmul.f32 0.6931472, %v2226_v41 }
 0x4b4   : > { %v2228_v45 = vpop.eup %2227 }
 0x4b5   : > { %v1643_v47 = vsel %vm1642_vm4, %v1640_v44, %v1637_v43  ;;  %v1646_v48 = vmul.f32 0.6931472, %v2228_v45 }
 0x4b6   : > { %v1653_v51 = vadd.f32 %v1643_v47, %v1621_v46 }
 0x4b7   : > { %v1652_v54 = vsel %vm1651_vm5, %v1649_v50, %v1646_v48 }
 0x4b8   : > { %v1655_v56 = vsel %vm1623_vm6, %v1615_v21, %v1653_v51  ;;  %v1654_v57 = vadd.f32 %v1652_v54, %v1622_v53 }
 0x4b9   : > { %v1974_v59 = vadd.f32 -0.6931472, %v1655_v56 }
 0x4ba   : > { %v1656_v58 = vsel %vm1624_vm7, %v1618_v25, %v1654_v57 }
 0x4bb   : > { %v1975_v60 = vadd.f32 -0.6931472, %v1656_v58 }
 0x4bd   : > { %v1659_v49 = vpack.c.bf16 %v1975_v60, %v1974_v59 }
 0x4bf   : > { %2094 = vmatmul.mubr.bf16.vlgmr.msra.gmra.mrb[8].mxu0 %v1659_v49 }
 0x592   : > { %v1765_v55 = vpop.f32.mrb[8].mxu0 }
 0x593   : > { %v1766_v61 = vadd.f32 %v1976_v52, %v1765_v55  ;;  %v2095_v62 = vpop.f32.mrb[9].mxu0 }
 0x594   : > { %v1768_v63 = vpop.f32.mrb[10].mxu0 }
 0x595   : > { %1772 = vst [vmem:[%s640_s28] sm:$0xff] %v1766_v61  ;;  %v1769_v0 = vadd.f32 %v1976_v52, %v1768_v63  ;;  %v2096_v1 = vpop.f32.mrb[11].mxu0 }
 0x597   : > { %1773 = vst [vmem:[%s640_s28 + $0x8] sm:$0xff] %v1769_v0 }
 0x598 PF: > { %s30_s0 = sadd.s32 1, %s2235_s0  }
 0x599   : > { %p27_p4 = scmp.ge.s32.totalorder %s30_s0, 4  }
 0x59b   :  { %29 = sbr.rel (!%p27_p4) target bundleno = 5 (0x5), region = 137 }

</bundles_post_ra>
